<compile_context>
chip_gen: v7x
topology: tpu7x:2x2x1
jax: 0.10.0
libtpu: 0.0.40
codegen_flags: <defaults>
</compile_context>

<pallas_src>
import functools

import numpy as np
import jax
import jax.numpy as jnp
from jax import lax
from jax.experimental import pallas as pl
from jax.experimental.pallas import tpu as pltpu


# ----------------------------------------------------------------------------
# Filters (deterministic, copied from the module's __init__)
# ----------------------------------------------------------------------------
LO_PASS = np.array(
    [[-0.0662912607, 0.1104854346, 0.6629126074, 0.6629126074, 0.1104854346, -0.0662912607],
     [-0.0855816496, -0.0855816496, 0.1711632992, 0.1711632992, -0.0855816496, -0.0855816496]],
    dtype=np.float32)  # (2, 6): [real taps, imag taps]
HI_PASS = np.array(
    [[-0.0662912607, -0.1104854346, 0.6629126074, -0.6629126074, 0.1104854346, 0.0662912607],
     [0.0855816496, -0.0855816496, -0.1711632992, 0.1711632992, 0.0855816496, -0.0855816496]],
    dtype=np.float32)  # (2, 6)


# ----------------------------------------------------------------------------
# Analysis matrices: out[j] = sum_t x[(2j + t - 3) mod L] * k[t]
# (circular pad of 3 on each side + cross-correlation + stride-2 downsample,
#  identical to the PyTorch F.pad(circular) + F.conv2d + [0:-1:2] path)
# ----------------------------------------------------------------------------
def _band_matrix(taps, L):
    M = np.zeros((L, L // 2), dtype=np.float32)
    for j in range(L // 2):
        for t in range(6):
            m = (2 * j + t - 3) % L
            M[m, j] += taps[t]
    return M


def _analysis_np(L):
    """A_real, A_imag, each (L, L) = [lo-band | hi-band] columns."""
    ar = np.concatenate([_band_matrix(LO_PASS[0], L), _band_matrix(HI_PASS[0], L)], axis=1)
    ai = np.concatenate([_band_matrix(LO_PASS[1], L), _band_matrix(HI_PASS[1], L)], axis=1)
    return ar, ai


_PACKED_CACHE = {}


def _packed_matrices(h, w):
    """Returns (Bh (2h,2h), Awr (w,w), Awi (w,w)) as jnp.float32.

    Bh is the packed-real left-transform:  Bh @ [[Xr],[Xi]] = [[Vr],[Vi]]
    with Vr = Ahr^T Xr - Ahi^T Xi,  Vi = Ahi^T Xr + Ahr^T Xi.
    """
    key = (h, w)
    if key not in _PACKED_CACHE:
        ahr, ahi = _analysis_np(h)
        awr, awi = _analysis_np(w)
        bh = np.block([[ahr.T, -ahi.T],
                       [ahi.T, ahr.T]]).astype(np.float32)       # (2h, 2h)
        _PACKED_CACHE[key] = (jnp.asarray(bh),
                              jnp.asarray(awr.astype(np.float32)),
                              jnp.asarray(awi.astype(np.float32)))
    return _PACKED_CACHE[key]


# ----------------------------------------------------------------------------
# Fused one-level 2-D complex wavelet decomposition kernel.
#
# Per block of tile_p planes, each plane stored sublane-stacked as (2h, w):
#   V_p = Bh @ X_p                         (vertical pass, per-plane matmul)
#   Pr  = V_all @ Awr,  Pi = V_all @ Awi   (merged horizontal pass, 2 matmuls)
#   Zr  = Pr[:, :h] - Pi[:, h:]            (= Vr Awr - Vi Awi)
#   Zi  = Pi[:, :h] + Pr[:, h:]            (= Vr Awi + Vi Awr)
#   out = [[Zr],[Zi]] per plane, stored via two sliced sublane-aligned stores.
# ----------------------------------------------------------------------------
def _fused_decompose_kernel(x_ref, bh_ref, awr_ref, awi_ref, o_ref, v_ref):
    tile_p, two_h, w = x_ref.shape
    h = two_h // 2

    bh = bh_ref[...]                       # (2h, 2h) -- resident across planes

    def _vpass(p, carry):
        # one packed complex vertical matmul per plane, straight into scratch
        v_ref[p] = jnp.dot(bh, x_ref[p], preferred_element_type=jnp.float32)
        return carry

    lax.fori_loop(0, tile_p, _vpass, 0, unroll=True)

    # Merged horizontal pass across all planes in the block (long-M matmuls).
    v_all = v_ref[...].reshape(tile_p * two_h, w)          # free reshape (2h % 8 == 0)
    awr = awr_ref[...]
    awi = awi_ref[...]
    pr = jnp.dot(v_all, awr, preferred_element_type=jnp.float32).reshape(tile_p, two_h, w)
    pi = jnp.dot(v_all, awi, preferred_element_type=jnp.float32).reshape(tile_p, two_h, w)

    # Recombination stored directly (no concatenate temporaries); both stores
    # are sublane-aligned at h.
    o_ref[:, :h, :] = pr[:, :h, :] - pi[:, h:, :]          # Zr
    o_ref[:, h:, :] = pi[:, :h, :] + pr[:, h:, :]          # Zi


# ----------------------------------------------------------------------------
# Generation-aware tiling
# ----------------------------------------------------------------------------
@functools.lru_cache(maxsize=1)
def _tpu_limits():
    """(vmem_capacity_bytes, tensorcores_per_device) with safe fallbacks."""
    vmem_bytes = 64 << 20          # conservative default = v7x per-core VMEM
    num_cores = 1
    try:
        info = pltpu.get_tpu_info()
        vmem_bytes = int(getattr(info, "vmem_capacity_bytes", vmem_bytes))
    except Exception:
        pass
    try:
        num_cores = int(getattr(jax.devices()[0], "num_cores", 1) or 1)
    except Exception:
        pass
    return vmem_bytes, num_cores


def _choose_tile_p(n_planes, h, w, vmem_bytes, num_cores):
    """Largest divisor of n_planes whose block budget fits comfortably in VMEM,
    keeps the unrolled vertical loop short, and (only on multi-TC chips) leaves
    at least one grid step per TensorCore."""
    plane_bytes = 2 * h * w * 4
    weight_bytes = (2 * h) * (2 * h) * 4 + 2 * w * w * 4
    # per-step VMEM ~= 2x weights (pipeline buffers) + 2x in + 2x out + 1x V scratch
    budget = max(plane_bytes, int(0.6 * vmem_bytes) - 2 * weight_bytes)
    cap = max(1, budget // (5 * plane_bytes))
    cap = min(cap, 8)                                  # short static unroll
    if num_cores >= 2 and n_planes >= num_cores:
        cap = min(cap, max(1, n_planes // num_cores))  # feed every TensorCore
    cap = min(cap, n_planes)
    best = 1
    for d in range(1, cap + 1):
        if n_planes % d == 0:
            best = d
    return best


def decompose_fused(src):
    """src: (B, C, 2, h, w) float32 -> (B, C, 2, h, w), quadrants [[LL,LH],[HL,HH]]."""
    B, C, _, h, w = src.shape
    n_planes = B * C
    bh, awr, awi = _packed_matrices(h, w)

    # Free, contiguous reshape: per plane the real plane sits on top of the
    # imag plane -> (2h, w) sublane-stacked layout the kernel expects.
    x2 = src.reshape(n_planes, 2 * h, w)

    vmem_bytes, num_cores = _tpu_limits()
    tile_p = _choose_tile_p(n_planes, h, w, vmem_bytes, num_cores)
    grid = (n_planes // tile_p,)

    plane_bytes = 2 * h * w * 4
    weight_bytes = (2 * h) * (2 * h) * 4 + 2 * w * w * 4
    needed = 2 * weight_bytes + 5 * tile_p * plane_bytes
    vmem_limit = int(min(int(0.9 * vmem_bytes), max(2 * needed, 32 << 20)))

    plane_spec = pl.BlockSpec((tile_p, 2 * h, w), lambda i: (i, 0, 0))
    bh_spec = pl.BlockSpec((2 * h, 2 * h), lambda i: (0, 0))
    aw_spec = pl.BlockSpec((w, w), lambda i: (0, 0))

    # flops: per plane, vertical (2h,2h)@(2h,w) + two horizontal (2h,w)@(w,w)
    flops = 2 * n_planes * ((2 * h) * (2 * h) * w + 2 * (2 * h) * w * w)
    bytes_accessed = 2 * n_planes * plane_bytes + weight_bytes

    out2 = pl.pallas_call(
        _fused_decompose_kernel,
        out_shape=jax.ShapeDtypeStruct((n_planes, 2 * h, w), jnp.float32),
        grid_spec=pltpu.PrefetchScalarGridSpec(
            num_scalar_prefetch=0,
            grid=grid,
            in_specs=[plane_spec, bh_spec, aw_spec, aw_spec],
            out_specs=plane_spec,
            scratch_shapes=[pltpu.VMEM((tile_p, 2 * h, w), jnp.float32)],
        ),
        compiler_params=pltpu.CompilerParams(
            dimension_semantics=("parallel",),
            vmem_limit_bytes=vmem_limit,
        ),
        cost_estimate=pl.CostEstimate(
            flops=int(flops), transcendentals=0, bytes_accessed=int(bytes_accessed)),
    )(x2, bh, awr, awi)

    return out2.reshape(B, C, 2, h, w)


# ----------------------------------------------------------------------------
# forward(): multi-level transform on the shrinking top-left (LL) block
# ----------------------------------------------------------------------------
@functools.partial(jax.jit, static_argnums=1)
def wavelet_forward(images, levels):
    """images: (B, C, 2, H, W) float32 -> (B, C, 2, H, W) float32."""
    B, C, two, H, W = images.shape
    if two != 2:
        raise ValueError("images must have shape (B, C, 2, H, W)")
    if levels < 1:
        raise ValueError("levels must be >= 1")
    if (H % (1 << levels)) or (W % (1 << levels)):
        raise ValueError("H and W must be divisible by 2**levels")
    if (H >> (levels - 1)) < 8 or (W >> (levels - 1)) < 8:
        raise ValueError("smallest pyramid level must be at least 8x8")

    images = images.astype(jnp.float32)
    result = None
    for i in range(levels):
        h, w = H >> i, W >> i
        src = images[:, :, :, :h, :w] if i == 0 else result[:, :, :, :h, :w]
        dec = decompose_fused(src)
        if i == 0:
            result = dec                       # level 0 covers the full area
        else:
            result = result.at[:, :, :, :h, :w].set(dec)   # in-place DUS under jit
    return result


# ----------------------------------------------------------------------------
# NumPy reference (independent gather-based path) for the correctness check
# ----------------------------------------------------------------------------
def _np_cconv(xr, xi, kr, ki):
    L = xr.shape[-1]
    idx = (2 * np.arange(L // 2)[:, None] + np.arange(6)[None, :] - 3) % L
    gr, gi = xr[..., idx], xi[..., idx]
    out_r = np.einsum('...jt,t->...j', gr, kr) - np.einsum('...jt,t->...j', gi, ki)
    out_i = np.einsum('...jt,t->...j', gr, ki) + np.einsum('...jt,t->...j', gi, kr)
    return out_r, out_i


def _np_decompose(xr, xi):
    xr_t, xi_t = np.swapaxes(xr, -1, -2), np.swapaxes(xi, -1, -2)
    lr, li = _np_cconv(xr_t, xi_t, LO_PASS[0], LO_PASS[1])
    hr, hi = _np_cconv(xr_t, xi_t, HI_PASS[0], HI_PASS[1])
    vr = np.swapaxes(np.concatenate([lr, hr], axis=-1), -1, -2)
    vi = np.swapaxes(np.concatenate([li, hi], axis=-1), -1, -2)
    lr, li = _np_cconv(vr, vi, LO_PASS[0], LO_PASS[1])
    hr, hi = _np_cconv(vr, vi, HI_PASS[0], HI_PASS[1])
    return np.concatenate([lr, hr], axis=-1), np.concatenate([li, hi], axis=-1)


def _np_forward(images, levels):
    B, C, _, H, W = images.shape
    result = np.zeros((B, C, 2, H, W), np.float32)
    for i in range(levels):
        h, w = H >> i, W >> i
        src = images[:, :, :, :h, :w].copy() if i == 0 else result[:, :, :, :h, :w].copy()
        zr, zi = _np_decompose(src[:, :, 0], src[:, :, 1])
        result[:, :, 0, :h, :w] = zr
        result[:, :, 1, :h, :w] = zi
    return result


if __name__ == "__main__":
    B, C, H, W = 2, 4, 16, 16
    levels = 2
    key = jax.random.PRNGKey(0)
    images = jax.random.uniform(key, (B, C, 2, H, W), dtype=jnp.float32,
                                minval=0.0, maxval=255.0)

    out = wavelet_forward(images, levels)
    out = jax.block_until_ready(out)

    ref = _np_forward(np.asarray(images), levels)
    np.testing.assert_allclose(np.asarray(out), ref, rtol=1e-4, atol=1e-3)

    print("KERNEL_OK")
</pallas_src>

<mosaic_0001>
module attributes {stable_mosaic.version = 11 : i64} {
  func.func @_fused_decompose_kernel(%arg0: i32, %arg1: memref<8x16x8xf32, #tpu.memory_space<vmem>>, %arg2: memref<16x16xf32, #tpu.memory_space<vmem>>, %arg3: memref<8x8xf32, #tpu.memory_space<vmem>>, %arg4: memref<8x8xf32, #tpu.memory_space<vmem>>, %arg5: memref<8x16x8xf32, #tpu.memory_space<vmem>>, %arg6: memref<8x16x8xf32, #tpu.memory_space<vmem>>) attributes {dimension_semantics = [#tpu.dimension_semantics<parallel>], iteration_bounds = array<i64: 1>, scalar_prefetch = 0 : i64, scratch_operands = 1 : i64, tpu.core_type = #tpu.core_type<tc>, window_params = [{transform_indices = @transform_0, window_bounds = array<i64: 8, 16, 8>}, {pipeline_mode = #tpu.pipeline_mode<synchronous>, transform_indices = @transform_1, window_bounds = array<i64: 16, 16>}, {pipeline_mode = #tpu.pipeline_mode<synchronous>, transform_indices = @transform_2, window_bounds = array<i64: 8, 8>}, {pipeline_mode = #tpu.pipeline_mode<synchronous>, transform_indices = @transform_3, window_bounds = array<i64: 8, 8>}, {transform_indices = @transform_4, window_bounds = array<i64: 8, 16, 8>}]} {
    %c0 = arith.constant 0 : index
    %c0_0 = arith.constant 0 : index
    %0 = vector.load %arg2[%c0, %c0_0] : memref<16x16xf32, #tpu.memory_space<vmem>>, vector<16x16xf32>
    %c0_i32 = arith.constant 0 : i32
    %1 = arith.index_cast %c0_i32 : i32 to index
    %c0_1 = arith.constant 0 : index
    %c0_2 = arith.constant 0 : index
    %2 = vector.load %arg1[%1, %c0_1, %c0_2] : memref<8x16x8xf32, #tpu.memory_space<vmem>>, vector<1x16x8xf32>
    %3 = vector.shape_cast %2 : vector<1x16x8xf32> to vector<16x8xf32>
    %cst = arith.constant dense<0.000000e+00> : vector<16x8xf32>
    %4 = tpu.matmul %0, %3, %cst {dimension_numbers = #tpu.dot_dimension_numbers<[1], [0], [0], [1], [0, 0, 1, 1], [], []>} : vector<16x16xf32>, vector<16x8xf32>, vector<16x8xf32> -> vector<16x8xf32>
    %5 = arith.index_cast %c0_i32 : i32 to index
    %c0_3 = arith.constant 0 : index
    %c0_4 = arith.constant 0 : index
    %6 = vector.load %arg6[%5, %c0_3, %c0_4] : memref<8x16x8xf32, #tpu.memory_space<vmem>>, vector<1x16x8xf32>
    %7 = vector.shape_cast %6 : vector<1x16x8xf32> to vector<16x8xf32>
    %8 = vector.shape_cast %4 : vector<16x8xf32> to vector<1x16x8xf32>
    tpu.vector_store %arg6[%5, %c0_3, %c0_4], %8 {strides = array<i32>} : memref<8x16x8xf32, #tpu.memory_space<vmem>>, vector<1x16x8xf32>,
    %c1_i32 = arith.constant 1 : i32
    %9 = arith.index_cast %c1_i32 : i32 to index
    %c0_5 = arith.constant 0 : index
    %c0_6 = arith.constant 0 : index
    %10 = vector.load %arg1[%9, %c0_5, %c0_6] : memref<8x16x8xf32, #tpu.memory_space<vmem>>, vector<1x16x8xf32>
    %11 = vector.shape_cast %10 : vector<1x16x8xf32> to vector<16x8xf32>
    %cst_7 = arith.constant dense<0.000000e+00> : vector<16x8xf32>
    %12 = tpu.matmul %0, %11, %cst_7 {dimension_numbers = #tpu.dot_dimension_numbers<[1], [0], [0], [1], [0, 0, 1, 1], [], []>} : vector<16x16xf32>, vector<16x8xf32>, vector<16x8xf32> -> vector<16x8xf32>
    %13 = arith.index_cast %c1_i32 : i32 to index
    %c0_8 = arith.constant 0 : index
    %c0_9 = arith.constant 0 : index
    %14 = vector.load %arg6[%13, %c0_8, %c0_9] : memref<8x16x8xf32, #tpu.memory_space<vmem>>, vector<1x16x8xf32>
    %15 = vector.shape_cast %14 : vector<1x16x8xf32> to vector<16x8xf32>
    %16 = vector.shape_cast %12 : vector<16x8xf32> to vector<1x16x8xf32>
    tpu.vector_store %arg6[%13, %c0_8, %c0_9], %16 {strides = array<i32>} : memref<8x16x8xf32, #tpu.memory_space<vmem>>, vector<1x16x8xf32>,
    %c2_i32 = arith.constant 2 : i32
    %17 = arith.index_cast %c2_i32 : i32 to index
    %c0_10 = arith.constant 0 : index
    %c0_11 = arith.constant 0 : index
    %18 = vector.load %arg1[%17, %c0_10, %c0_11] : memref<8x16x8xf32, #tpu.memory_space<vmem>>, vector<1x16x8xf32>
    %19 = vector.shape_cast %18 : vector<1x16x8xf32> to vector<16x8xf32>
    %cst_12 = arith.constant dense<0.000000e+00> : vector<16x8xf32>
    %20 = tpu.matmul %0, %19, %cst_12 {dimension_numbers = #tpu.dot_dimension_numbers<[1], [0], [0], [1], [0, 0, 1, 1], [], []>} : vector<16x16xf32>, vector<16x8xf32>, vector<16x8xf32> -> vector<16x8xf32>
    %21 = arith.index_cast %c2_i32 : i32 to index
    %c0_13 = arith.constant 0 : index
    %c0_14 = arith.constant 0 : index
    %22 = vector.load %arg6[%21, %c0_13, %c0_14] : memref<8x16x8xf32, #tpu.memory_space<vmem>>, vector<1x16x8xf32>
    %23 = vector.shape_cast %22 : vector<1x16x8xf32> to vector<16x8xf32>
    %24 = vector.shape_cast %20 : vector<16x8xf32> to vector<1x16x8xf32>
    tpu.vector_store %arg6[%21, %c0_13, %c0_14], %24 {strides = array<i32>} : memref<8x16x8xf32, #tpu.memory_space<vmem>>, vector<1x16x8xf32>,
    %c3_i32 = arith.constant 3 : i32
    %25 = arith.index_cast %c3_i32 : i32 to index
    %c0_15 = arith.constant 0 : index
    %c0_16 = arith.constant 0 : index
    %26 = vector.load %arg1[%25, %c0_15, %c0_16] : memref<8x16x8xf32, #tpu.memory_space<vmem>>, vector<1x16x8xf32>
    %27 = vector.shape_cast %26 : vector<1x16x8xf32> to vector<16x8xf32>
    %cst_17 = arith.constant dense<0.000000e+00> : vector<16x8xf32>
    %28 = tpu.matmul %0, %27, %cst_17 {dimension_numbers = #tpu.dot_dimension_numbers<[1], [0], [0], [1], [0, 0, 1, 1], [], []>} : vector<16x16xf32>, vector<16x8xf32>, vector<16x8xf32> -> vector<16x8xf32>
    %29 = arith.index_cast %c3_i32 : i32 to index
    %c0_18 = arith.constant 0 : index
    %c0_19 = arith.constant 0 : index
    %30 = vector.load %arg6[%29, %c0_18, %c0_19] : memref<8x16x8xf32, #tpu.memory_space<vmem>>, vector<1x16x8xf32>
    %31 = vector.shape_cast %30 : vector<1x16x8xf32> to vector<16x8xf32>
    %32 = vector.shape_cast %28 : vector<16x8xf32> to vector<1x16x8xf32>
    tpu.vector_store %arg6[%29, %c0_18, %c0_19], %32 {strides = array<i32>} : memref<8x16x8xf32, #tpu.memory_space<vmem>>, vector<1x16x8xf32>,
    %c4_i32 = arith.constant 4 : i32
    %33 = arith.index_cast %c4_i32 : i32 to index
    %c0_20 = arith.constant 0 : index
    %c0_21 = arith.constant 0 : index
    %34 = vector.load %arg1[%33, %c0_20, %c0_21] : memref<8x16x8xf32, #tpu.memory_space<vmem>>, vector<1x16x8xf32>
    %35 = vector.shape_cast %34 : vector<1x16x8xf32> to vector<16x8xf32>
    %cst_22 = arith.constant dense<0.000000e+00> : vector<16x8xf32>
    %36 = tpu.matmul %0, %35, %cst_22 {dimension_numbers = #tpu.dot_dimension_numbers<[1], [0], [0], [1], [0, 0, 1, 1], [], []>} : vector<16x16xf32>, vector<16x8xf32>, vector<16x8xf32> -> vector<16x8xf32>
    %37 = arith.index_cast %c4_i32 : i32 to index
    %c0_23 = arith.constant 0 : index
    %c0_24 = arith.constant 0 : index
    %38 = vector.load %arg6[%37, %c0_23, %c0_24] : memref<8x16x8xf32, #tpu.memory_space<vmem>>, vector<1x16x8xf32>
    %39 = vector.shape_cast %38 : vector<1x16x8xf32> to vector<16x8xf32>
    %40 = vector.shape_cast %36 : vector<16x8xf32> to vector<1x16x8xf32>
    tpu.vector_store %arg6[%37, %c0_23, %c0_24], %40 {strides = array<i32>} : memref<8x16x8xf32, #tpu.memory_space<vmem>>, vector<1x16x8xf32>,
    %c5_i32 = arith.constant 5 : i32
    %41 = arith.index_cast %c5_i32 : i32 to index
    %c0_25 = arith.constant 0 : index
    %c0_26 = arith.constant 0 : index
    %42 = vector.load %arg1[%41, %c0_25, %c0_26] : memref<8x16x8xf32, #tpu.memory_space<vmem>>, vector<1x16x8xf32>
    %43 = vector.shape_cast %42 : vector<1x16x8xf32> to vector<16x8xf32>
    %cst_27 = arith.constant dense<0.000000e+00> : vector<16x8xf32>
    %44 = tpu.matmul %0, %43, %cst_27 {dimension_numbers = #tpu.dot_dimension_numbers<[1], [0], [0], [1], [0, 0, 1, 1], [], []>} : vector<16x16xf32>, vector<16x8xf32>, vector<16x8xf32> -> vector<16x8xf32>
    %45 = arith.index_cast %c5_i32 : i32 to index
    %c0_28 = arith.constant 0 : index
    %c0_29 = arith.constant 0 : index
    %46 = vector.load %arg6[%45, %c0_28, %c0_29] : memref<8x16x8xf32, #tpu.memory_space<vmem>>, vector<1x16x8xf32>
    %47 = vector.shape_cast %46 : vector<1x16x8xf32> to vector<16x8xf32>
    %48 = vector.shape_cast %44 : vector<16x8xf32> to vector<1x16x8xf32>
    tpu.vector_store %arg6[%45, %c0_28, %c0_29], %48 {strides = array<i32>} : memref<8x16x8xf32, #tpu.memory_space<vmem>>, vector<1x16x8xf32>,
    %c6_i32 = arith.constant 6 : i32
    %49 = arith.index_cast %c6_i32 : i32 to index
    %c0_30 = arith.constant 0 : index
    %c0_31 = arith.constant 0 : index
    %50 = vector.load %arg1[%49, %c0_30, %c0_31] : memref<8x16x8xf32, #tpu.memory_space<vmem>>, vector<1x16x8xf32>
    %51 = vector.shape_cast %50 : vector<1x16x8xf32> to vector<16x8xf32>
    %cst_32 = arith.constant dense<0.000000e+00> : vector<16x8xf32>
    %52 = tpu.matmul %0, %51, %cst_32 {dimension_numbers = #tpu.dot_dimension_numbers<[1], [0], [0], [1], [0, 0, 1, 1], [], []>} : vector<16x16xf32>, vector<16x8xf32>, vector<16x8xf32> -> vector<16x8xf32>
    %53 = arith.index_cast %c6_i32 : i32 to index
    %c0_33 = arith.constant 0 : index
    %c0_34 = arith.constant 0 : index
    %54 = vector.load %arg6[%53, %c0_33, %c0_34] : memref<8x16x8xf32, #tpu.memory_space<vmem>>, vector<1x16x8xf32>
    %55 = vector.shape_cast %54 : vector<1x16x8xf32> to vector<16x8xf32>
    %56 = vector.shape_cast %52 : vector<16x8xf32> to vector<1x16x8xf32>
    tpu.vector_store %arg6[%53, %c0_33, %c0_34], %56 {strides = array<i32>} : memref<8x16x8xf32, #tpu.memory_space<vmem>>, vector<1x16x8xf32>,
    %c7_i32 = arith.constant 7 : i32
    %57 = arith.index_cast %c7_i32 : i32 to index
    %c0_35 = arith.constant 0 : index
    %c0_36 = arith.constant 0 : index
    %58 = vector.load %arg1[%57, %c0_35, %c0_36] : memref<8x16x8xf32, #tpu.memory_space<vmem>>, vector<1x16x8xf32>
    %59 = vector.shape_cast %58 : vector<1x16x8xf32> to vector<16x8xf32>
    %cst_37 = arith.constant dense<0.000000e+00> : vector<16x8xf32>
    %60 = tpu.matmul %0, %59, %cst_37 {dimension_numbers = #tpu.dot_dimension_numbers<[1], [0], [0], [1], [0, 0, 1, 1], [], []>} : vector<16x16xf32>, vector<16x8xf32>, vector<16x8xf32> -> vector<16x8xf32>
    %61 = arith.index_cast %c7_i32 : i32 to index
    %c0_38 = arith.constant 0 : index
    %c0_39 = arith.constant 0 : index
    %62 = vector.load %arg6[%61, %c0_38, %c0_39] : memref<8x16x8xf32, #tpu.memory_space<vmem>>, vector<1x16x8xf32>
    %63 = vector.shape_cast %62 : vector<1x16x8xf32> to vector<16x8xf32>
    %64 = vector.shape_cast %60 : vector<16x8xf32> to vector<1x16x8xf32>
    tpu.vector_store %arg6[%61, %c0_38, %c0_39], %64 {strides = array<i32>} : memref<8x16x8xf32, #tpu.memory_space<vmem>>, vector<1x16x8xf32>,
    %c8_i32 = arith.constant 8 : i32
    %c0_40 = arith.constant 0 : index
    %c0_41 = arith.constant 0 : index
    %c0_42 = arith.constant 0 : index
    %65 = vector.load %arg6[%c0_40, %c0_41, %c0_42] : memref<8x16x8xf32, #tpu.memory_space<vmem>>, vector<8x16x8xf32>
    %66 = vector.shape_cast %65 : vector<8x16x8xf32> to vector<128x8xf32>
    %c0_43 = arith.constant 0 : index
    %c0_44 = arith.constant 0 : index
    %67 = vector.load %arg3[%c0_43, %c0_44] : memref<8x8xf32, #tpu.memory_space<vmem>>, vector<8x8xf32>
    %c0_45 = arith.constant 0 : index
    %c0_46 = arith.constant 0 : index
    %68 = vector.load %arg4[%c0_45, %c0_46] : memref<8x8xf32, #tpu.memory_space<vmem>>, vector<8x8xf32>
    %cst_47 = arith.constant dense<0.000000e+00> : vector<128x8xf32>
    %69 = tpu.matmul %66, %67, %cst_47 {dimension_numbers = #tpu.dot_dimension_numbers<[1], [0], [0], [1], [0, 0, 1, 1], [], []>} : vector<128x8xf32>, vector<8x8xf32>, vector<128x8xf32> -> vector<128x8xf32>
    %70 = vector.shape_cast %69 : vector<128x8xf32> to vector<8x16x8xf32>
    %cst_48 = arith.constant dense<0.000000e+00> : vector<128x8xf32>
    %71 = tpu.matmul %66, %68, %cst_48 {dimension_numbers = #tpu.dot_dimension_numbers<[1], [0], [0], [1], [0, 0, 1, 1], [], []>} : vector<128x8xf32>, vector<8x8xf32>, vector<128x8xf32> -> vector<128x8xf32>
    %72 = vector.shape_cast %71 : vector<128x8xf32> to vector<8x16x8xf32>
    %73 = vector.extract_strided_slice %70 {offsets = [0, 0, 0], sizes = [8, 8, 8], strides = [1, 1, 1]} : vector<8x16x8xf32> to vector<8x8x8xf32>
    %74 = vector.extract_strided_slice %72 {offsets = [0, 8, 0], sizes = [8, 8, 8], strides = [1, 1, 1]} : vector<8x16x8xf32> to vector<8x8x8xf32>
    %75 = arith.subf %73, %74 : vector<8x8x8xf32>
    %c0_49 = arith.constant 0 : index
    %c0_50 = arith.constant 0 : index
    %c0_51 = arith.constant 0 : index
    %76 = vector.load %arg5[%c0_49, %c0_50, %c0_51] : memref<8x16x8xf32, #tpu.memory_space<vmem>>, vector<8x8x8xf32>
    tpu.vector_store %arg5[%c0_49, %c0_50, %c0_51], %75 {strides = array<i32>} : memref<8x16x8xf32, #tpu.memory_space<vmem>>, vector<8x8x8xf32>,
    %77 = vector.extract_strided_slice %72 {offsets = [0, 0, 0], sizes = [8, 8, 8], strides = [1, 1, 1]} : vector<8x16x8xf32> to vector<8x8x8xf32>
    %78 = vector.extract_strided_slice %70 {offsets = [0, 8, 0], sizes = [8, 8, 8], strides = [1, 1, 1]} : vector<8x16x8xf32> to vector<8x8x8xf32>
    %79 = arith.addf %77, %78 : vector<8x8x8xf32>
    %c0_52 = arith.constant 0 : index
    %c8 = arith.constant 8 : index
    %c0_53 = arith.constant 0 : index
    %80 = vector.load %arg5[%c0_52, %c8, %c0_53] : memref<8x16x8xf32, #tpu.memory_space<vmem>>, vector<8x8x8xf32>
    tpu.vector_store %arg5[%c0_52, %c8, %c0_53], %79 {strides = array<i32>} : memref<8x16x8xf32, #tpu.memory_space<vmem>>, vector<8x8x8xf32>,
    return
  }
  func.func @transform_0(%arg0: i32) -> (i32, i32, i32) {
    %c0_i32 = arith.constant 0 : i32
    %c0_i32_0 = arith.constant 0 : i32
    %c0_i32_1 = arith.constant 0 : i32
    return %arg0, %c0_i32, %c0_i32_0 : i32, i32, i32
  }
  func.func @transform_1(%arg0: i32) -> (i32, i32) {
    %c0_i32 = arith.constant 0 : i32
    %c0_i32_0 = arith.constant 0 : i32
    %c0_i32_1 = arith.constant 0 : i32
    return %c0_i32, %c0_i32_0 : i32, i32
  }
  func.func @transform_2(%arg0: i32) -> (i32, i32) {
    %c0_i32 = arith.constant 0 : i32
    %c0_i32_0 = arith.constant 0 : i32
    %c0_i32_1 = arith.constant 0 : i32
    return %c0_i32, %c0_i32_0 : i32, i32
  }
  func.func @transform_3(%arg0: i32) -> (i32, i32) {
    %c0_i32 = arith.constant 0 : i32
    %c0_i32_0 = arith.constant 0 : i32
    %c0_i32_1 = arith.constant 0 : i32
    return %c0_i32, %c0_i32_0 : i32, i32
  }
  func.func @transform_4(%arg0: i32) -> (i32, i32, i32) {
    %c0_i32 = arith.constant 0 : i32
    %c0_i32_0 = arith.constant 0 : i32
    %c0_i32_1 = arith.constant 0 : i32
    return %arg0, %c0_i32, %c0_i32_0 : i32, i32, i32
  }
}

module attributes {stable_mosaic.version = 11 : i64} {
  func.func @_fused_decompose_kernel(%arg0: i32, %arg1: memref<8x32x16xf32, #tpu.memory_space<vmem>>, %arg2: memref<32x32xf32, #tpu.memory_space<vmem>>, %arg3: memref<16x16xf32, #tpu.memory_space<vmem>>, %arg4: memref<16x16xf32, #tpu.memory_space<vmem>>, %arg5: memref<8x32x16xf32, #tpu.memory_space<vmem>>, %arg6: memref<8x32x16xf32, #tpu.memory_space<vmem>>) attributes {dimension_semantics = [#tpu.dimension_semantics<parallel>], iteration_bounds = array<i64: 1>, scalar_prefetch = 0 : i64, scratch_operands = 1 : i64, tpu.core_type = #tpu.core_type<tc>, window_params = [{transform_indices = @transform_0, window_bounds = array<i64: 8, 32, 16>}, {pipeline_mode = #tpu.pipeline_mode<synchronous>, transform_indices = @transform_1, window_bounds = array<i64: 32, 32>}, {pipeline_mode = #tpu.pipeline_mode<synchronous>, transform_indices = @transform_2, window_bounds = array<i64: 16, 16>}, {pipeline_mode = #tpu.pipeline_mode<synchronous>, transform_indices = @transform_3, window_bounds = array<i64: 16, 16>}, {transform_indices = @transform_4, window_bounds = array<i64: 8, 32, 16>}]} {
    %c0 = arith.constant 0 : index
    %c0_0 = arith.constant 0 : index
    %0 = vector.load %arg2[%c0, %c0_0] : memref<32x32xf32, #tpu.memory_space<vmem>>, vector<32x32xf32>
    %c0_i32 = arith.constant 0 : i32
    %1 = arith.index_cast %c0_i32 : i32 to index
    %c0_1 = arith.constant 0 : index
    %c0_2 = arith.constant 0 : index
    %2 = vector.load %arg1[%1, %c0_1, %c0_2] : memref<8x32x16xf32, #tpu.memory_space<vmem>>, vector<1x32x16xf32>
    %3 = vector.shape_cast %2 : vector<1x32x16xf32> to vector<32x16xf32>
    %cst = arith.constant dense<0.000000e+00> : vector<32x16xf32>
    %4 = tpu.matmul %0, %3, %cst {dimension_numbers = #tpu.dot_dimension_numbers<[1], [0], [0], [1], [0, 0, 1, 1], [], []>} : vector<32x32xf32>, vector<32x16xf32>, vector<32x16xf32> -> vector<32x16xf32>
    %5 = arith.index_cast %c0_i32 : i32 to index
    %c0_3 = arith.constant 0 : index
    %c0_4 = arith.constant 0 : index
    %6 = vector.load %arg6[%5, %c0_3, %c0_4] : memref<8x32x16xf32, #tpu.memory_space<vmem>>, vector<1x32x16xf32>
    %7 = vector.shape_cast %6 : vector<1x32x16xf32> to vector<32x16xf32>
    %8 = vector.shape_cast %4 : vector<32x16xf32> to vector<1x32x16xf32>
    tpu.vector_store %arg6[%5, %c0_3, %c0_4], %8 {strides = array<i32>} : memref<8x32x16xf32, #tpu.memory_space<vmem>>, vector<1x32x16xf32>,
    %c1_i32 = arith.constant 1 : i32
    %9 = arith.index_cast %c1_i32 : i32 to index
    %c0_5 = arith.constant 0 : index
    %c0_6 = arith.constant 0 : index
    %10 = vector.load %arg1[%9, %c0_5, %c0_6] : memref<8x32x16xf32, #tpu.memory_space<vmem>>, vector<1x32x16xf32>
    %11 = vector.shape_cast %10 : vector<1x32x16xf32> to vector<32x16xf32>
    %cst_7 = arith.constant dense<0.000000e+00> : vector<32x16xf32>
    %12 = tpu.matmul %0, %11, %cst_7 {dimension_numbers = #tpu.dot_dimension_numbers<[1], [0], [0], [1], [0, 0, 1, 1], [], []>} : vector<32x32xf32>, vector<32x16xf32>, vector<32x16xf32> -> vector<32x16xf32>
    %13 = arith.index_cast %c1_i32 : i32 to index
    %c0_8 = arith.constant 0 : index
    %c0_9 = arith.constant 0 : index
    %14 = vector.load %arg6[%13, %c0_8, %c0_9] : memref<8x32x16xf32, #tpu.memory_space<vmem>>, vector<1x32x16xf32>
    %15 = vector.shape_cast %14 : vector<1x32x16xf32> to vector<32x16xf32>
    %16 = vector.shape_cast %12 : vector<32x16xf32> to vector<1x32x16xf32>
    tpu.vector_store %arg6[%13, %c0_8, %c0_9], %16 {strides = array<i32>} : memref<8x32x16xf32, #tpu.memory_space<vmem>>, vector<1x32x16xf32>,
    %c2_i32 = arith.constant 2 : i32
    %17 = arith.index_cast %c2_i32 : i32 to index
    %c0_10 = arith.constant 0 : index
    %c0_11 = arith.constant 0 : index
    %18 = vector.load %arg1[%17, %c0_10, %c0_11] : memref<8x32x16xf32, #tpu.memory_space<vmem>>, vector<1x32x16xf32>
    %19 = vector.shape_cast %18 : vector<1x32x16xf32> to vector<32x16xf32>
    %cst_12 = arith.constant dense<0.000000e+00> : vector<32x16xf32>
    %20 = tpu.matmul %0, %19, %cst_12 {dimension_numbers = #tpu.dot_dimension_numbers<[1], [0], [0], [1], [0, 0, 1, 1], [], []>} : vector<32x32xf32>, vector<32x16xf32>, vector<32x16xf32> -> vector<32x16xf32>
    %21 = arith.index_cast %c2_i32 : i32 to index
    %c0_13 = arith.constant 0 : index
    %c0_14 = arith.constant 0 : index
    %22 = vector.load %arg6[%21, %c0_13, %c0_14] : memref<8x32x16xf32, #tpu.memory_space<vmem>>, vector<1x32x16xf32>
    %23 = vector.shape_cast %22 : vector<1x32x16xf32> to vector<32x16xf32>
    %24 = vector.shape_cast %20 : vector<32x16xf32> to vector<1x32x16xf32>
    tpu.vector_store %arg6[%21, %c0_13, %c0_14], %24 {strides = array<i32>} : memref<8x32x16xf32, #tpu.memory_space<vmem>>, vector<1x32x16xf32>,
    %c3_i32 = arith.constant 3 : i32
    %25 = arith.index_cast %c3_i32 : i32 to index
    %c0_15 = arith.constant 0 : index
    %c0_16 = arith.constant 0 : index
    %26 = vector.load %arg1[%25, %c0_15, %c0_16] : memref<8x32x16xf32, #tpu.memory_space<vmem>>, vector<1x32x16xf32>
    %27 = vector.shape_cast %26 : vector<1x32x16xf32> to vector<32x16xf32>
    %cst_17 = arith.constant dense<0.000000e+00> : vector<32x16xf32>
    %28 = tpu.matmul %0, %27, %cst_17 {dimension_numbers = #tpu.dot_dimension_numbers<[1], [0], [0], [1], [0, 0, 1, 1], [], []>} : vector<32x32xf32>, vector<32x16xf32>, vector<32x16xf32> -> vector<32x16xf32>
    %29 = arith.index_cast %c3_i32 : i32 to index
    %c0_18 = arith.constant 0 : index
    %c0_19 = arith.constant 0 : index
    %30 = vector.load %arg6[%29, %c0_18, %c0_19] : memref<8x32x16xf32, #tpu.memory_space<vmem>>, vector<1x32x16xf32>
    %31 = vector.shape_cast %30 : vector<1x32x16xf32> to vector<32x16xf32>
    %32 = vector.shape_cast %28 : vector<32x16xf32> to vector<1x32x16xf32>
    tpu.vector_store %arg6[%29, %c0_18, %c0_19], %32 {strides = array<i32>} : memref<8x32x16xf32, #tpu.memory_space<vmem>>, vector<1x32x16xf32>,
    %c4_i32 = arith.constant 4 : i32
    %33 = arith.index_cast %c4_i32 : i32 to index
    %c0_20 = arith.constant 0 : index
    %c0_21 = arith.constant 0 : index
    %34 = vector.load %arg1[%33, %c0_20, %c0_21] : memref<8x32x16xf32, #tpu.memory_space<vmem>>, vector<1x32x16xf32>
    %35 = vector.shape_cast %34 : vector<1x32x16xf32> to vector<32x16xf32>
    %cst_22 = arith.constant dense<0.000000e+00> : vector<32x16xf32>
    %36 = tpu.matmul %0, %35, %cst_22 {dimension_numbers = #tpu.dot_dimension_numbers<[1], [0], [0], [1], [0, 0, 1, 1], [], []>} : vector<32x32xf32>, vector<32x16xf32>, vector<32x16xf32> -> vector<32x16xf32>
    %37 = arith.index_cast %c4_i32 : i32 to index
    %c0_23 = arith.constant 0 : index
    %c0_24 = arith.constant 0 : index
    %38 = vector.load %arg6[%37, %c0_23, %c0_24] : memref<8x32x16xf32, #tpu.memory_space<vmem>>, vector<1x32x16xf32>
    %39 = vector.shape_cast %38 : vector<1x32x16xf32> to vector<32x16xf32>
    %40 = vector.shape_cast %36 : vector<32x16xf32> to vector<1x32x16xf32>
    tpu.vector_store %arg6[%37, %c0_23, %c0_24], %40 {strides = array<i32>} : memref<8x32x16xf32, #tpu.memory_space<vmem>>, vector<1x32x16xf32>,
    %c5_i32 = arith.constant 5 : i32
    %41 = arith.index_cast %c5_i32 : i32 to index
    %c0_25 = arith.constant 0 : index
    %c0_26 = arith.constant 0 : index
    %42 = vector.load %arg1[%41, %c0_25, %c0_26] : memref<8x32x16xf32, #tpu.memory_space<vmem>>, vector<1x32x16xf32>
    %43 = vector.shape_cast %42 : vector<1x32x16xf32> to vector<32x16xf32>
    %cst_27 = arith.constant dense<0.000000e+00> : vector<32x16xf32>
    %44 = tpu.matmul %0, %43, %cst_27 {dimension_numbers = #tpu.dot_dimension_numbers<[1], [0], [0], [1], [0, 0, 1, 1], [], []>} : vector<32x32xf32>, vector<32x16xf32>, vector<32x16xf32> -> vector<32x16xf32>
    %45 = arith.index_cast %c5_i32 : i32 to index
    %c0_28 = arith.constant 0 : index
    %c0_29 = arith.constant 0 : index
    %46 = vector.load %arg6[%45, %c0_28, %c0_29] : memref<8x32x16xf32, #tpu.memory_space<vmem>>, vector<1x32x16xf32>
    %47 = vector.shape_cast %46 : vector<1x32x16xf32> to vector<32x16xf32>
    %48 = vector.shape_cast %44 : vector<32x16xf32> to vector<1x32x16xf32>
    tpu.vector_store %arg6[%45, %c0_28, %c0_29], %48 {strides = array<i32>} : memref<8x32x16xf32, #tpu.memory_space<vmem>>, vector<1x32x16xf32>,
    %c6_i32 = arith.constant 6 : i32
    %49 = arith.index_cast %c6_i32 : i32 to index
    %c0_30 = arith.constant 0 : index
    %c0_31 = arith.constant 0 : index
    %50 = vector.load %arg1[%49, %c0_30, %c0_31] : memref<8x32x16xf32, #tpu.memory_space<vmem>>, vector<1x32x16xf32>
    %51 = vector.shape_cast %50 : vector<1x32x16xf32> to vector<32x16xf32>
    %cst_32 = arith.constant dense<0.000000e+00> : vector<32x16xf32>
    %52 = tpu.matmul %0, %51, %cst_32 {dimension_numbers = #tpu.dot_dimension_numbers<[1], [0], [0], [1], [0, 0, 1, 1], [], []>} : vector<32x32xf32>, vector<32x16xf32>, vector<32x16xf32> -> vector<32x16xf32>
    %53 = arith.index_cast %c6_i32 : i32 to index
    %c0_33 = arith.constant 0 : index
    %c0_34 = arith.constant 0 : index
    %54 = vector.load %arg6[%53, %c0_33, %c0_34] : memref<8x32x16xf32, #tpu.memory_space<vmem>>, vector<1x32x16xf32>
    %55 = vector.shape_cast %54 : vector<1x32x16xf32> to vector<32x16xf32>
    %56 = vector.shape_cast %52 : vector<32x16xf32> to vector<1x32x16xf32>
    tpu.vector_store %arg6[%53, %c0_33, %c0_34], %56 {strides = array<i32>} : memref<8x32x16xf32, #tpu.memory_space<vmem>>, vector<1x32x16xf32>,
    %c7_i32 = arith.constant 7 : i32
    %57 = arith.index_cast %c7_i32 : i32 to index
    %c0_35 = arith.constant 0 : index
    %c0_36 = arith.constant 0 : index
    %58 = vector.load %arg1[%57, %c0_35, %c0_36] : memref<8x32x16xf32, #tpu.memory_space<vmem>>, vector<1x32x16xf32>
    %59 = vector.shape_cast %58 : vector<1x32x16xf32> to vector<32x16xf32>
    %cst_37 = arith.constant dense<0.000000e+00> : vector<32x16xf32>
    %60 = tpu.matmul %0, %59, %cst_37 {dimension_numbers = #tpu.dot_dimension_numbers<[1], [0], [0], [1], [0, 0, 1, 1], [], []>} : vector<32x32xf32>, vector<32x16xf32>, vector<32x16xf32> -> vector<32x16xf32>
    %61 = arith.index_cast %c7_i32 : i32 to index
    %c0_38 = arith.constant 0 : index
    %c0_39 = arith.constant 0 : index
    %62 = vector.load %arg6[%61, %c0_38, %c0_39] : memref<8x32x16xf32, #tpu.memory_space<vmem>>, vector<1x32x16xf32>
    %63 = vector.shape_cast %62 : vector<1x32x16xf32> to vector<32x16xf32>
    %64 = vector.shape_cast %60 : vector<32x16xf32> to vector<1x32x16xf32>
    tpu.vector_store %arg6[%61, %c0_38, %c0_39], %64 {strides = array<i32>} : memref<8x32x16xf32, #tpu.memory_space<vmem>>, vector<1x32x16xf32>,
    %c8_i32 = arith.constant 8 : i32
    %c0_40 = arith.constant 0 : index
    %c0_41 = arith.constant 0 : index
    %c0_42 = arith.constant 0 : index
    %65 = vector.load %arg6[%c0_40, %c0_41, %c0_42] : memref<8x32x16xf32, #tpu.memory_space<vmem>>, vector<8x32x16xf32>
    %66 = vector.shape_cast %65 : vector<8x32x16xf32> to vector<256x16xf32>
    %c0_43 = arith.constant 0 : index
    %c0_44 = arith.constant 0 : index
    %67 = vector.load %arg3[%c0_43, %c0_44] : memref<16x16xf32, #tpu.memory_space<vmem>>, vector<16x16xf32>
    %c0_45 = arith.constant 0 : index
    %c0_46 = arith.constant 0 : index
    %68 = vector.load %arg4[%c0_45, %c0_46] : memref<16x16xf32, #tpu.memory_space<vmem>>, vector<16x16xf32>
    %cst_47 = arith.constant dense<0.000000e+00> : vector<256x16xf32>
    %69 = tpu.matmul %66, %67, %cst_47 {dimension_numbers = #tpu.dot_dimension_numbers<[1], [0], [0], [1], [0, 0, 1, 1], [], []>} : vector<256x16xf32>, vector<16x16xf32>, vector<256x16xf32> -> vector<256x16xf32>
    %70 = vector.shape_cast %69 : vector<256x16xf32> to vector<8x32x16xf32>
    %cst_48 = arith.constant dense<0.000000e+00> : vector<256x16xf32>
    %71 = tpu.matmul %66, %68, %cst_48 {dimension_numbers = #tpu.dot_dimension_numbers<[1], [0], [0], [1], [0, 0, 1, 1], [], []>} : vector<256x16xf32>, vector<16x16xf32>, vector<256x16xf32> -> vector<256x16xf32>
    %72 = vector.shape_cast %71 : vector<256x16xf32> to vector<8x32x16xf32>
    %73 = vector.extract_strided_slice %70 {offsets = [0, 0, 0], sizes = [8, 16, 16], strides = [1, 1, 1]} : vector<8x32x16xf32> to vector<8x16x16xf32>
    %74 = vector.extract_strided_slice %72 {offsets = [0, 16, 0], sizes = [8, 16, 16], strides = [1, 1, 1]} : vector<8x32x16xf32> to vector<8x16x16xf32>
    %75 = arith.subf %73, %74 : vector<8x16x16xf32>
    %c0_49 = arith.constant 0 : index
    %c0_50 = arith.constant 0 : index
    %c0_51 = arith.constant 0 : index
    %76 = vector.load %arg5[%c0_49, %c0_50, %c0_51] : memref<8x32x16xf32, #tpu.memory_space<vmem>>, vector<8x16x16xf32>
    tpu.vector_store %arg5[%c0_49, %c0_50, %c0_51], %75 {strides = array<i32>} : memref<8x32x16xf32, #tpu.memory_space<vmem>>, vector<8x16x16xf32>,
    %77 = vector.extract_strided_slice %72 {offsets = [0, 0, 0], sizes = [8, 16, 16], strides = [1, 1, 1]} : vector<8x32x16xf32> to vector<8x16x16xf32>
    %78 = vector.extract_strided_slice %70 {offsets = [0, 16, 0], sizes = [8, 16, 16], strides = [1, 1, 1]} : vector<8x32x16xf32> to vector<8x16x16xf32>
    %79 = arith.addf %77, %78 : vector<8x16x16xf32>
    %c0_52 = arith.constant 0 : index
    %c16 = arith.constant 16 : index
    %c0_53 = arith.constant 0 : index
    %80 = vector.load %arg5[%c0_52, %c16, %c0_53] : memref<8x32x16xf32, #tpu.memory_space<vmem>>, vector<8x16x16xf32>
    tpu.vector_store %arg5[%c0_52, %c16, %c0_53], %79 {strides = array<i32>} : memref<8x32x16xf32, #tpu.memory_space<vmem>>, vector<8x16x16xf32>,
    return
  }
  func.func @transform_0(%arg0: i32) -> (i32, i32, i32) {
    %c0_i32 = arith.constant 0 : i32
    %c0_i32_0 = arith.constant 0 : i32
    %c0_i32_1 = arith.constant 0 : i32
    return %arg0, %c0_i32, %c0_i32_0 : i32, i32, i32
  }
  func.func @transform_1(%arg0: i32) -> (i32, i32) {
    %c0_i32 = arith.constant 0 : i32
    %c0_i32_0 = arith.constant 0 : i32
    %c0_i32_1 = arith.constant 0 : i32
    return %c0_i32, %c0_i32_0 : i32, i32
  }
  func.func @transform_2(%arg0: i32) -> (i32, i32) {
    %c0_i32 = arith.constant 0 : i32
    %c0_i32_0 = arith.constant 0 : i32
    %c0_i32_1 = arith.constant 0 : i32
    return %c0_i32, %c0_i32_0 : i32, i32
  }
  func.func @transform_3(%arg0: i32) -> (i32, i32) {
    %c0_i32 = arith.constant 0 : i32
    %c0_i32_0 = arith.constant 0 : i32
    %c0_i32_1 = arith.constant 0 : i32
    return %c0_i32, %c0_i32_0 : i32, i32
  }
  func.func @transform_4(%arg0: i32) -> (i32, i32, i32) {
    %c0_i32 = arith.constant 0 : i32
    %c0_i32_0 = arith.constant 0 : i32
    %c0_i32_1 = arith.constant 0 : i32
    return %arg0, %c0_i32, %c0_i32_0 : i32, i32, i32
  }
}

</mosaic_0001>

<bundles_post_ra>
// kernel: wavelet_forward.3
= control target key start
LH: loop header
LB: loop body
LE: loop exit
PB: predicated region body
PF: predicated region fallthrough
CT: control target
= control target key end

     0   :  { %vm21_vm0 = vcmask 130048   ;;  %vm103_vm1 = vcmask 64512   ;;  %s1546_s0 = inlined_call_operand.vmem [shape: f32[8,16,8], index: 0, kind: input, shape index: {}]   ;;  %s1547_s1 = inlined_call_operand.vmem [shape: f32[16,16], index: 1, kind: input, shape index: {}]   ;;  %s1548_s2 = inlined_call_operand.vmem [shape: f32[8,8], index: 2, kind: input, shape index: {}]   ;;  %s1549_s3 = inlined_call_operand.vmem [shape: f32[8,8], index: 3, kind: input, shape index: {}]   ;;  %s1550_s4 = inlined_call_operand.vmem [shape: f32[8,16,8], index: 4, kind: output, shape index: {}]  }
   0x1   :  { %v19_v0 = vld [vmem:[%s1546_s0] sm:$0xff]  ;;  %v20_v1 = vld [vmem:[%s1546_s0 + $0x8] sm:$0xff]  ;;  %v1067_v4 = vld [vmem:[%s1546_s0 + $0x10] sm:$0xff] }
   0x2   :  { %v17_v2 = vld [vmem:[%s1547_s1] sm:$0xff]  ;;  %v1301_v3 = vpack.c.bf16 %v20_v1, %v19_v0  ;;  %v1068_v5 = vld [vmem:[%s1546_s0 + $0x18] sm:$0xff]  ;;  %v1072_v8 = vld [vmem:[%s1546_s0 + $0x28] sm:$0xff] }
   0x3   :  { %1197 = vmatprep.mubr.msk.f32.mxu0 %vm21_vm0, %v17_v2  ;;  %1204 = vmatprep.mubr.msk.f32.mxu1 %vm21_vm0, %v17_v2  ;;  %v1305_v6 = vpack.c.bf16 %v1068_v5, %v1067_v4  ;;  %v1071_v7 = vld [vmem:[%s1546_s0 + $0x20] sm:$0xff]  ;;  %v1075_v9 = vld [vmem:[%s1546_s0 + $0x30] sm:$0xff]  ;;  %v1076_v11 = vld [vmem:[%s1546_s0 + $0x38] sm:$0xff] }
   0x4   :  { %1302 = vmatprep.subr.bf16.mxu0 %v1301_v3  ;;  %v1309_v10 = vpack.c.bf16 %v1072_v8, %v1071_v7  ;;  %v1079_v12 = vld [vmem:[%s1546_s0 + $0x40] sm:$0xff]  ;;  %v1080_v13 = vld [vmem:[%s1546_s0 + $0x48] sm:$0xff]  ;;  %v1313_v15 = vpack.c.bf16 %v1076_v11, %v1075_v9  ;;  %v1083_v16 = vld [vmem:[%s1546_s0 + $0x50] sm:$0xff] }
   0x5   :  { %1304 = vmatpush3.bf16.msra.mxu0 %v1301_v3  ;;  %1306 = vmatprep.subr.bf16.mxu1 %v1305_v6  ;;  %v18_v14 = vld [vmem:[%s1547_s1 + $0x8] sm:$0xff]  ;;  %v1084_v17 = vld [vmem:[%s1546_s0 + $0x58] sm:$0xff]  ;;  %v1317_v18 = vpack.c.bf16 %v1080_v13, %v1079_v12  ;;  %v1087_v20 = vld [vmem:[%s1546_s0 + $0x60] sm:$0xff] }
   0x6   :  { %1308 = vmatpush3.bf16.msra.mxu1 %v1305_v6  ;;  %1310 = vmatprep.subr.bf16.mxu0 %v1309_v10  ;;  %v1321_v19 = vpack.c.bf16 %v1084_v17, %v1083_v16  ;;  %v1088_v21 = vld [vmem:[%s1546_s0 + $0x68] sm:$0xff]  ;;  %v1091_v22 = vld [vmem:[%s1546_s0 + $0x70] sm:$0xff]  ;;  %v1092_v23 = vld [vmem:[%s1546_s0 + $0x78] sm:$0xff] }
   0x7   :  { %1314 = vmatprep.subr.bf16.mxu1 %v1313_v15  ;;  %v1325_v24 = vpack.c.bf16 %v1088_v21, %v1087_v20  ;;  %v1329_v25 = vpack.c.bf16 %v1092_v23, %v1091_v22  ;;  %v689_v26 = vld [vmem:[%s1548_s2] sm:$0xff] }
   0x8   :  { %1198 = vmatmul.mubr.msk.f32.vlgmr.msra.gmra.mrb[0].mxu0 %vm21_vm0, %v18_v14  ;;  %v690_v27 = vld [vmem:[%s1549_s3] sm:$0xff] }
   0x9   :  { %1205 = vmatmul.mubr.msk.f32.vlgmr.msra.gmra.mrb[0].mxu1 %vm21_vm0, %v18_v14  ;;  %1312 = vmatpush3.bf16.msra.mxu0 %v1309_v10 }
   0xa   :  { %1211 = vmatprep.mubr.msk.f32.mxu0 %vm21_vm0, %v17_v2  ;;  %1316 = vmatpush3.bf16.msra.mxu1 %v1313_v15 }
   0xb   :  { %1218 = vmatprep.mubr.msk.f32.mxu1 %vm21_vm0, %v17_v2  ;;  %1318 = vmatprep.subr.bf16.mxu0 %v1317_v18 }
   0xc   :  { %1212 = vmatmul.mubr.msk.f32.vlgmr.msra.gmra.mrb[2].mxu0 %vm21_vm0, %v18_v14  ;;  %1322 = vmatprep.subr.bf16.mxu1 %v1321_v19 }
   0xd   :  { %1219 = vmatmul.mubr.msk.f32.vlgmr.msra.gmra.mrb[2].mxu1 %vm21_vm0, %v18_v14  ;;  %1320 = vmatpush3.bf16.msra.mxu0 %v1317_v18 }
   0xe   :  { %1225 = vmatprep.mubr.msk.f32.mxu0 %vm21_vm0, %v17_v2  ;;  %1324 = vmatpush3.bf16.msra.mxu1 %v1321_v19 }
   0xf   :  { %1232 = vmatprep.mubr.msk.f32.mxu1 %vm21_vm0, %v17_v2  ;;  %1326 = vmatprep.subr.bf16.mxu0 %v1325_v24 }
  0x10   :  { %1226 = vmatmul.mubr.msk.f32.vlgmr.msra.gmra.mrb[4].mxu0 %vm21_vm0, %v18_v14  ;;  %1330 = vmatprep.subr.bf16.mxu1 %v1329_v25 }
  0x11   :  { %1233 = vmatmul.mubr.msk.f32.vlgmr.msra.gmra.mrb[4].mxu1 %vm21_vm0, %v18_v14  ;;  %1328 = vmatpush3.bf16.msra.mxu0 %v1325_v24 }
  0x12   :  { %1239 = vmatprep.mubr.msk.f32.mxu0 %vm21_vm0, %v17_v2  ;;  %1332 = vmatpush3.bf16.msra.mxu1 %v1329_v25 }
  0x13   :  { %1246 = vmatprep.mubr.msk.f32.mxu1 %vm21_vm0, %v17_v2  ;;  %1249 = vmatprep.subr.mxu0 %v689_v26 }
  0x14   :  { %1240 = vmatmul.mubr.msk.f32.vlgmr.msra.gmra.mrb[6].mxu0 %vm21_vm0, %v18_v14  ;;  %1275 = vmatprep.subr.mxu1 %v690_v27 }
  0x15   :  { %1247 = vmatmul.mubr.msk.f32.vlgmr.msra.gmra.mrb[6].mxu1 %vm21_vm0, %v18_v14  ;;  %1250 = vmatpush3.msra.mxu0 %v689_v26 }
  0x16   :  { %1276 = vmatpush3.msra.mxu1 %v690_v27 }
  0xdb   :  { %v1199_v28 = vpop.f32.mrb[0].mxu0 }
  0xdc   :  { %105 = vst.msk [vmem:[#allocation2 + $0x8] sm:$0xff] %vm103_vm1, %v1199_v28  ;;  %v94_v29 = vpop.f32.mrb[1].mxu0  ;;  %v1206_v30 = vpop.f32.mrb[0].mxu1 }
  0xdd   :  { %104 = vst.msk [vmem:[#allocation2] sm:$0xff] %vm103_vm1, %v94_v29  ;;  %186 = vst.msk [vmem:[#allocation2 + $0x18] sm:$0xff] %vm103_vm1, %v1206_v30  ;;  %v175_v31 = vpop.f32.mrb[1].mxu1 }
  0xde   :  { %185 = vst.msk [vmem:[#allocation2 + $0x10] sm:$0xff] %vm103_vm1, %v175_v31 }
  0xdf   :  { %v1213_v32 = vpop.f32.mrb[2].mxu0 }
  0xe0   :  { %267 = vst.msk [vmem:[#allocation2 + $0x28] sm:$0xff] %vm103_vm1, %v1213_v32  ;;  %v256_v33 = vpop.f32.mrb[3].mxu0  ;;  %v1220_v34 = vpop.f32.mrb[2].mxu1 }
  0xe1   :  { %266 = vst.msk [vmem:[#allocation2 + $0x20] sm:$0xff] %vm103_vm1, %v256_v33  ;;  %348 = vst.msk [vmem:[#allocation2 + $0x38] sm:$0xff] %vm103_vm1, %v1220_v34  ;;  %v337_v35 = vpop.f32.mrb[3].mxu1 }
  0xe2   :  { %347 = vst.msk [vmem:[#allocation2 + $0x30] sm:$0xff] %vm103_vm1, %v337_v35 }
  0xe3   :  { %v1227_v36 = vpop.f32.mrb[4].mxu0  ;;  %v674_v40 = vld [vmem:[#allocation2 + $0x8] sm:$0xff] }
  0xe4   :  { %v673_v37 = vld [vmem:[#allocation2] sm:$0xff]  ;;  %429 = vst.msk [vmem:[#allocation2 + $0x48] sm:$0xff] %vm103_vm1, %v1227_v36  ;;  %v418_v38 = vpop.f32.mrb[5].mxu0  ;;  %v1234_v39 = vpop.f32.mrb[4].mxu1  ;;  %v676_v47 = vld [vmem:[#allocation2 + $0x18] sm:$0xff] }
  0xe5   :  { %1251 = vmatprep.mubr.msk.f32.mxu0 %vm103_vm1, %v673_v37  ;;  %1277 = vmatprep.mubr.msk.f32.mxu1 %vm103_vm1, %v673_v37  ;;  %v675_v41 = vld [vmem:[#allocation2 + $0x10] sm:$0xff]  ;;  %428 = vst.msk [vmem:[#allocation2 + $0x40] sm:$0xff] %vm103_vm1, %v418_v38  ;;  %510 = vst.msk [vmem:[#allocation2 + $0x58] sm:$0xff] %vm103_vm1, %v1234_v39  ;;  %v499_v42 = vpop.f32.mrb[5].mxu1 }
  0xe6   :  { %1252 = vmatmul.mubr.msk.f32.vlgmr.msra.gmra.mrb[8].mxu0 %vm103_vm1, %v674_v40  ;;  %1278 = vmatmul.mubr.msk.f32.vlgmr.msra.gmra.mrb[8].mxu1 %vm103_vm1, %v674_v40  ;;  %509 = vst.msk [vmem:[#allocation2 + $0x50] sm:$0xff] %vm103_vm1, %v499_v42 }
  0xe7   :  { %1254 = vmatprep.mubr.msk.f32.mxu0 %vm103_vm1, %v675_v41  ;;  %1280 = vmatprep.mubr.msk.f32.mxu1 %vm103_vm1, %v675_v41  ;;  %v1241_v43 = vpop.f32.mrb[6].mxu0  ;;  %v678_v50 = vld [vmem:[#allocation2 + $0x28] sm:$0xff] }
  0xe8   :  { %v677_v44 = vld [vmem:[#allocation2 + $0x20] sm:$0xff]  ;;  %591 = vst.msk [vmem:[#allocation2 + $0x68] sm:$0xff] %vm103_vm1, %v1241_v43  ;;  %v580_v45 = vpop.f32.mrb[7].mxu0  ;;  %v1248_v46 = vpop.f32.mrb[6].mxu1  ;;  %v680_v52 = vld [vmem:[#allocation2 + $0x38] sm:$0xff] }
  0xe9   :  { %590 = vst.msk [vmem:[#allocation2 + $0x60] sm:$0xff] %vm103_vm1, %v580_v45  ;;  %672 = vst.msk [vmem:[#allocation2 + $0x78] sm:$0xff] %vm103_vm1, %v1248_v46  ;;  %v661_v48 = vpop.f32.mrb[7].mxu1  ;;  %v679_v49 = vld [vmem:[#allocation2 + $0x30] sm:$0xff] }
  0xea   :  { %1255 = vmatmul.mubr.msk.f32.gmra.mrb[10].mxu0 %vm103_vm1, %v676_v47  ;;  %1281 = vmatmul.mubr.msk.f32.gmra.mrb[10].mxu1 %vm103_vm1, %v676_v47  ;;  %671 = vst.msk [vmem:[#allocation2 + $0x70] sm:$0xff] %vm103_vm1, %v661_v48 }
  0xeb   :  { %1257 = vmatprep.mubr.msk.f32.mxu0 %vm103_vm1, %v677_v44  ;;  %1283 = vmatprep.mubr.msk.f32.mxu1 %vm103_vm1, %v677_v44  ;;  %v682_v54 = vld [vmem:[#allocation2 + $0x48] sm:$0xff] }
  0xec   :  { %v681_v51 = vld [vmem:[#allocation2 + $0x40] sm:$0xff]  ;;  %v684_v56 = vld [vmem:[#allocation2 + $0x58] sm:$0xff] }
  0xed   :  { %v683_v53 = vld [vmem:[#allocation2 + $0x50] sm:$0xff] }
  0xee   :  { %1258 = vmatmul.mubr.msk.f32.gmra.mrb[12].mxu0 %vm103_vm1, %v678_v50  ;;  %1284 = vmatmul.mubr.msk.f32.gmra.mrb[12].mxu1 %vm103_vm1, %v678_v50 }
  0xef   :  { %1260 = vmatprep.mubr.msk.f32.mxu0 %vm103_vm1, %v679_v49  ;;  %1286 = vmatprep.mubr.msk.f32.mxu1 %vm103_vm1, %v679_v49  ;;  %v686_v58 = vld [vmem:[#allocation2 + $0x68] sm:$0xff] }
  0xf0   :  { %v685_v55 = vld [vmem:[#allocation2 + $0x60] sm:$0xff]  ;;  %v688_v59 = vld [vmem:[#allocation2 + $0x78] sm:$0xff] }
  0xf1   :  { %v687_v57 = vld [vmem:[#allocation2 + $0x70] sm:$0xff] }
  0xf2   :  { %1261 = vmatmul.mubr.msk.f32.gmra.mrb[14].mxu0 %vm103_vm1, %v680_v52  ;;  %1287 = vmatmul.mubr.msk.f32.gmra.mrb[14].mxu1 %vm103_vm1, %v680_v52 }
  0xf3   :  { %1263 = vmatprep.mubr.msk.f32.mxu0 %vm103_vm1, %v681_v51  ;;  %1289 = vmatprep.mubr.msk.f32.mxu1 %vm103_vm1, %v681_v51 }
  0xf6   :  { %1264 = vmatmul.mubr.msk.f32.gmra.mrb[16].mxu0 %vm103_vm1, %v682_v54  ;;  %1290 = vmatmul.mubr.msk.f32.gmra.mrb[16].mxu1 %vm103_vm1, %v682_v54 }
  0xf7   :  { %1266 = vmatprep.mubr.msk.f32.mxu0 %vm103_vm1, %v683_v53  ;;  %1292 = vmatprep.mubr.msk.f32.mxu1 %vm103_vm1, %v683_v53 }
  0xfa   :  { %1267 = vmatmul.mubr.msk.f32.gmra.mrb[18].mxu0 %vm103_vm1, %v684_v56  ;;  %1293 = vmatmul.mubr.msk.f32.gmra.mrb[18].mxu1 %vm103_vm1, %v684_v56 }
  0xfb   :  { %1269 = vmatprep.mubr.msk.f32.mxu0 %vm103_vm1, %v685_v55  ;;  %1295 = vmatprep.mubr.msk.f32.mxu1 %vm103_vm1, %v685_v55 }
  0xfe   :  { %1270 = vmatmul.mubr.msk.f32.gmra.mrb[20].mxu0 %vm103_vm1, %v686_v58  ;;  %1296 = vmatmul.mubr.msk.f32.gmra.mrb[20].mxu1 %vm103_vm1, %v686_v58 }
  0xff   :  { %1272 = vmatprep.mubr.msk.f32.mxu0 %vm103_vm1, %v687_v57  ;;  %1298 = vmatprep.mubr.msk.f32.mxu1 %vm103_vm1, %v687_v57 }
 0x102   :  { %1273 = vmatmul.mubr.msk.f32.gmra.mrb[22].mxu0 %vm103_vm1, %v688_v59  ;;  %1299 = vmatmul.mubr.msk.f32.gmra.mrb[22].mxu1 %vm103_vm1, %v688_v59 }
 0x1b9   :  { %v1253_v60 = vpop.f32.mrb[8].mxu0  ;;  %v1279_v61 = vpop.f32.mrb[8].mxu1 }
 0x1ba   :  { %v805_v62 = vpop.f32.mrb[9].mxu0  ;;  %v950_v63 = vpop.f32.mrb[9].mxu1 }
 0x1bb   :  { %v1029_v0 = vsub.f32 %v805_v62, %v1279_v61  ;;  %v1045_v1 = vadd.f32 %v1253_v60, %v950_v63 }
 0x1bd   :  { %1037 = vst.msk [vmem:[%s1550_s4] sm:$0xff] %vm103_vm1, %v1029_v0  ;;  %1053 = vst.msk [vmem:[%s1550_s4 + $0x8] sm:$0xff] %vm103_vm1, %v1045_v1  ;;  %v1256_v2 = vpop.f32.mrb[10].mxu0  ;;  %v1282_v3 = vpop.f32.mrb[10].mxu1 }
 0x1be   :  { %v815_v4 = vpop.f32.mrb[11].mxu0  ;;  %v960_v5 = vpop.f32.mrb[11].mxu1 }
 0x1bf   :  { %v1030_v6 = vsub.f32 %v815_v4, %v1282_v3  ;;  %v1046_v7 = vadd.f32 %v1256_v2, %v960_v5 }
 0x1c1   :  { %1038 = vst.msk [vmem:[%s1550_s4 + $0x10] sm:$0xff] %vm103_vm1, %v1030_v6  ;;  %1054 = vst.msk [vmem:[%s1550_s4 + $0x18] sm:$0xff] %vm103_vm1, %v1046_v7  ;;  %v1259_v8 = vpop.f32.mrb[12].mxu0  ;;  %v1285_v9 = vpop.f32.mrb[12].mxu1 }
 0x1c2   :  { %v825_v10 = vpop.f32.mrb[13].mxu0  ;;  %v970_v11 = vpop.f32.mrb[13].mxu1 }
 0x1c3   :  { %v1031_v12 = vsub.f32 %v825_v10, %v1285_v9  ;;  %v1047_v13 = vadd.f32 %v1259_v8, %v970_v11 }
 0x1c5   :  { %1039 = vst.msk [vmem:[%s1550_s4 + $0x20] sm:$0xff] %vm103_vm1, %v1031_v12  ;;  %1055 = vst.msk [vmem:[%s1550_s4 + $0x28] sm:$0xff] %vm103_vm1, %v1047_v13  ;;  %v1262_v14 = vpop.f32.mrb[14].mxu0  ;;  %v1288_v15 = vpop.f32.mrb[14].mxu1 }
 0x1c6   :  { %v835_v16 = vpop.f32.mrb[15].mxu0  ;;  %v980_v17 = vpop.f32.mrb[15].mxu1 }
 0x1c7   :  { %v1032_v18 = vsub.f32 %v835_v16, %v1288_v15  ;;  %v1048_v19 = vadd.f32 %v1262_v14, %v980_v17 }
 0x1c9   :  { %1040 = vst.msk [vmem:[%s1550_s4 + $0x30] sm:$0xff] %vm103_vm1, %v1032_v18  ;;  %1056 = vst.msk [vmem:[%s1550_s4 + $0x38] sm:$0xff] %vm103_vm1, %v1048_v19  ;;  %v1265_v20 = vpop.f32.mrb[16].mxu0  ;;  %v1291_v21 = vpop.f32.mrb[16].mxu1 }
 0x1ca   :  { %v845_v22 = vpop.f32.mrb[17].mxu0  ;;  %v990_v23 = vpop.f32.mrb[17].mxu1 }
 0x1cb   :  { %v1033_v24 = vsub.f32 %v845_v22, %v1291_v21  ;;  %v1049_v25 = vadd.f32 %v1265_v20, %v990_v23 }
 0x1cd   :  { %1041 = vst.msk [vmem:[%s1550_s4 + $0x40] sm:$0xff] %vm103_vm1, %v1033_v24  ;;  %1057 = vst.msk [vmem:[%s1550_s4 + $0x48] sm:$0xff] %vm103_vm1, %v1049_v25  ;;  %v1268_v26 = vpop.f32.mrb[18].mxu0  ;;  %v1294_v27 = vpop.f32.mrb[18].mxu1 }
 0x1ce   :  { %v855_v28 = vpop.f32.mrb[19].mxu0  ;;  %v1000_v29 = vpop.f32.mrb[19].mxu1 }
 0x1cf   :  { %v1034_v30 = vsub.f32 %v855_v28, %v1294_v27  ;;  %v1050_v31 = vadd.f32 %v1268_v26, %v1000_v29 }
 0x1d1   :  { %1042 = vst.msk [vmem:[%s1550_s4 + $0x50] sm:$0xff] %vm103_vm1, %v1034_v30  ;;  %1058 = vst.msk [vmem:[%s1550_s4 + $0x58] sm:$0xff] %vm103_vm1, %v1050_v31  ;;  %v1271_v32 = vpop.f32.mrb[20].mxu0  ;;  %v1297_v33 = vpop.f32.mrb[20].mxu1 }
 0x1d2   :  { %v865_v34 = vpop.f32.mrb[21].mxu0  ;;  %v1010_v35 = vpop.f32.mrb[21].mxu1 }
 0x1d3   :  { %v1035_v36 = vsub.f32 %v865_v34, %v1297_v33  ;;  %v1051_v37 = vadd.f32 %v1271_v32, %v1010_v35 }
 0x1d5   :  { %1043 = vst.msk [vmem:[%s1550_s4 + $0x60] sm:$0xff] %vm103_vm1, %v1035_v36  ;;  %1059 = vst.msk [vmem:[%s1550_s4 + $0x68] sm:$0xff] %vm103_vm1, %v1051_v37  ;;  %v1274_v38 = vpop.f32.mrb[22].mxu0  ;;  %v1300_v39 = vpop.f32.mrb[22].mxu1 }
 0x1d6   :  { %v875_v40 = vpop.f32.mrb[23].mxu0  ;;  %v1020_v41 = vpop.f32.mrb[23].mxu1 }
 0x1d7   :  { %v1036_v42 = vsub.f32 %v875_v40, %v1300_v39  ;;  %v1052_v43 = vadd.f32 %v1274_v38, %v1020_v41 }
 0x1d9   :  { %1044 = vst.msk [vmem:[%s1550_s4 + $0x70] sm:$0xff] %vm103_vm1, %v1036_v42  ;;  %1060 = vst.msk [vmem:[%s1550_s4 + $0x78] sm:$0xff] %vm103_vm1, %v1052_v43 }

// kernel: wavelet_forward.2
= control target key start
LH: loop header
LB: loop body
LE: loop exit
PB: predicated region body
PF: predicated region fallthrough
CT: control target
= control target key end

     0   :  { %9 = vsyncpa [#allocation4], 0  ;;  %s2477_s0 = inlined_call_operand.hbm [shape: f32[8,32,16], index: 0, kind: input, shape index: {}]   ;;  %s2478_s1 = inlined_call_operand.hbm [shape: f32[32,32], index: 1, kind: input, shape index: {}]   ;;  %s2479_s2 = inlined_call_operand.hbm [shape: f32[16,16], index: 2, kind: input, shape index: {}]   ;;  %s2480_s3 = inlined_call_operand.vmem [shape: f32[16,16], index: 3, kind: input, shape index: {}]   ;;  %s2481_s4 = inlined_call_operand.vmem [shape: f32[8,32,16], index: 4, kind: output, shape index: {}]  }
   0x1   :  { %10 = vsyncpa [#allocation6], 0  ;;  %s2093_s15 = smov [#allocation5]   ;;  %s2094_s17 = smov [#allocation3]  }
   0x2   :  { %s28_s16 = sshll.u32 %s2093_s15, 4  ;;  %s16_s18 = sshll.u32 %s2094_s17, 4  ;;  %s29_s16 = int_to_ptr.vmem [resolvable:$true] %s28_s16  ;;  %s2123_s18 = int_to_ptr.vmem [resolvable:$true] %s16_s18 }
   0x3   :  { %s2023_s21 = scalar_lea.hbm %s2478_s1, 512 }
   0x4   :  { %p2024_p0 = scmp.ne.s32.totalorder %s2478_s1, %s2023_s21  ;;  %p2027_p1 = scmp.lt.u32.totalorder %s2023_s21, %s2478_s1 }
   0x6   :  { %p2029_p2 = pnand %p2027_p1, %p2024_p0 }
   0x8   :  { %2032 = shalt.err (!%p2029_p2)
}
   0x9   :  { %s2033_s26 = scalar_lea.vmem %s29_s16, 512  ;;  %p2038_p4 = scmp.lt.s32.totalorder %s29_s16, %s29_s16 }
   0xa   :  { %p2034_p3 = scmp.ne.s32.totalorder %s29_s16, %s2033_s26  ;;  %p2039_p5 = scmp.lt.s32.totalorder %s2033_s26, %s2033_s26 }
   0xc   :  { %p2040_p6 = por %p2039_p5, %p2038_p4 }
   0xe   :  { %p2041_p7 = pnand %p2040_p6, %p2034_p3 }
  0x10   :  { %2044 = shalt.err (!%p2041_p7)
}
  0x11   :  { %s2095_s27 = smov 128   ;;  %s2096_s28 = smov 8  }
  0x12   :  { %34 = dma.hbm_to_vmem [thread:$0]  %s2478_s1, 512, %s29_s16, [#allocation6], %s2095_s27, %s2095_s27, %s2096_s28  }
  0x13   :  { %s2045_s7 = scalar_lea.hbm %s2477_s0, 4096 }
  0x14   :  { %p2046_p8 = scmp.ne.s32.totalorder %s2477_s0, %s2045_s7  ;;  %p2049_p9 = scmp.lt.u32.totalorder %s2045_s7, %s2477_s0 }
  0x16   :  { %p2051_p10 = pnand %p2049_p9, %p2046_p8 }
  0x18   :  { %2054 = shalt.err (!%p2051_p10)
}
  0x19   :  { %s2055_s12 = scalar_lea.vmem %s2123_s18, 4096  ;;  %p2060_p12 = scmp.lt.s32.totalorder %s2123_s18, %s2123_s18 }
  0x1a   :  { %p2056_p11 = scmp.ne.s32.totalorder %s2123_s18, %s2055_s12  ;;  %p2061_p13 = scmp.lt.s32.totalorder %s2055_s12, %s2055_s12 }
  0x1c   :  { %p2062_p0 = por %p2061_p13, %p2060_p12 }
  0x1e   :  { %p2063_p1 = pnand %p2062_p0, %p2056_p11 }
  0x20   :  { %2066 = shalt.err (!%p2063_p1)
}
  0x21   :  { %22 = dma.hbm_to_vmem [thread:$0]  %s2477_s0, 4096, %s2123_s18, [#allocation4], %s2095_s27, %s2095_s27, %s2096_s28  }
  0x22   :  { %s2097_s14 = smov [#allocation7]   ;;  %s2067_s19 = scalar_lea.hbm %s2479_s2, 256 }
  0x23   :  { %s40_s15 = sshll.u32 %s2097_s14, 4  ;;  %p2068_p2 = scmp.ne.s32.totalorder %s2479_s2, %s2067_s19  ;;  %s41_s15 = int_to_ptr.vmem [resolvable:$true] %s40_s15 }
  0x24   :  { %p2071_p3 = scmp.lt.u32.totalorder %s2067_s19, %s2479_s2 }
  0x26   :  { %p2073_p4 = pnand %p2071_p3, %p2068_p2 }
  0x28   :  { %2076 = shalt.err (!%p2073_p4)
}
  0x29   :  { %s2077_s24 = scalar_lea.vmem %s41_s15, 256  ;;  %p2082_p6 = scmp.lt.s32.totalorder %s41_s15, %s41_s15 }
  0x2a   :  { %p2078_p5 = scmp.ne.s32.totalorder %s41_s15, %s2077_s24  ;;  %p2083_p7 = scmp.lt.s32.totalorder %s2077_s24, %s2077_s24 }
  0x2c   :  { %p2084_p8 = por %p2083_p7, %p2082_p6 }
  0x2e   :  { %p2085_p9 = pnand %p2084_p8, %p2078_p5 }
  0x30   :  { %2088 = shalt.err (!%p2085_p9)
}
  0x31   :  { %46 = dma.hbm_to_vmem [thread:$0]  %s2479_s2, 256, %s41_s15, [#allocation6], %s2095_s27, %s2095_s27, %s2096_s28  }
  0x32   :  { %2089 = dma.done.wait [#allocation4], 4096  }
  0x33   :  { %2090 = vsyncadd [#allocation4], 4294963200 }
  0x34   :  { %2091 = dma.done.wait [#allocation6], 768  }
  0x35   :  { %2092 = vsyncadd [#allocation6], 4294966528  ;;  %vm66_vm0 = vcmask 261120   ;;  %v62_v0 = vld [vmem:[#allocation3] sm:$0xff]  ;;  %v63_v1 = vld [vmem:[#allocation3 + $0x8] sm:$0xff]  ;;  %vm164_vm1 = vcmask 130048  }
  0x36   :  { %v64_v2 = vld [vmem:[#allocation3 + $0x10] sm:$0xff]  ;;  %v1930_v3 = vpack.c.bf16 %v63_v1, %v62_v0  ;;  %v65_v4 = vld [vmem:[#allocation3 + $0x18] sm:$0xff]  ;;  %v2175_v5 = vld [vmem:[#allocation5] sm:$0xff] }
  0x37   :  { %v170_v6 = vld [vmem:[#allocation3 + $0x20] sm:$0xff]  ;;  %v1934_v7 = vpack.c.bf16 %v65_v4, %v64_v2  ;;  %1722 = vmatprep.mubr.msk.f32.mxu0 %vm66_vm0, %v2175_v5  ;;  %v171_v8 = vld [vmem:[#allocation3 + $0x28] sm:$0xff]  ;;  %1736 = vmatprep.mubr.msk.f32.mxu1 %vm66_vm0, %v2175_v5  ;;  %v172_v10 = vld [vmem:[#allocation3 + $0x30] sm:$0xff] }
  0x38   :  { %1931 = vmatprep.subr.bf16.mxu0 %v1930_v3  ;;  %v1938_v9 = vpack.c.bf16 %v171_v8, %v170_v6  ;;  %v173_v11 = vld [vmem:[#allocation3 + $0x38] sm:$0xff]  ;;  %v265_v13 = vld [vmem:[#allocation3 + $0x40] sm:$0xff]  ;;  %v266_v14 = vld [vmem:[#allocation3 + $0x48] sm:$0xff] }
  0x39   :  { %1933 = vmatpush3.bf16.msra.mxu0 %v1930_v3  ;;  %v1942_v12 = vpack.c.bf16 %v173_v11, %v172_v10  ;;  %v1946_v15 = vpack.c.bf16 %v266_v14, %v265_v13  ;;  %v360_v16 = vld [vmem:[#allocation3 + $0x60] sm:$0xff]  ;;  %v361_v17 = vld [vmem:[#allocation3 + $0x68] sm:$0xff]  ;;  %v267_v18 = vld [vmem:[#allocation3 + $0x50] sm:$0xff] }
  0x3a   :  { %1935 = vmatprep.subr.bf16.mxu0 %v1934_v7  ;;  %1939 = vmatprep.subr.bf16.mxu1 %v1938_v9  ;;  %v268_v19 = vld [vmem:[#allocation3 + $0x58] sm:$0xff]  ;;  %v1954_v20 = vpack.c.bf16 %v361_v17, %v360_v16  ;;  %v2181_v21 = vld [vmem:[#allocation5 + $0x8] sm:$0xff]  ;;  %v362_v22 = vld [vmem:[#allocation3 + $0x70] sm:$0xff] }
  0x3b   :  { %1941 = vmatpush3.bf16.msra.mxu1 %v1938_v9  ;;  %v363_v23 = vld [vmem:[#allocation3 + $0x78] sm:$0xff]  ;;  %v2183_v24 = vld [vmem:[#allocation5 + $0x10] sm:$0xff]  ;;  %v1950_v25 = vpack.c.bf16 %v268_v19, %v267_v18  ;;  %v455_v26 = vld [vmem:[#allocation3 + $0x80] sm:$0xff] }
  0x3c   :  { %1943 = vmatprep.subr.bf16.mxu1 %v1942_v12  ;;  %v456_v27 = vld [vmem:[#allocation3 + $0x88] sm:$0xff]  ;;  %v1958_v28 = vpack.c.bf16 %v363_v23, %v362_v22  ;;  %v2189_v29 = vld [vmem:[#allocation5 + $0x18] sm:$0xff]  ;;  %v550_v30 = vld [vmem:[#allocation3 + $0xa0] sm:$0xff] }
  0x3d   :  { %1937 = vmatpush3.bf16.msra.mxu0 %v1934_v7  ;;  %v551_v31 = vld [vmem:[#allocation3 + $0xa8] sm:$0xff]  ;;  %v1962_v32 = vpack.c.bf16 %v456_v27, %v455_v26  ;;  %v457_v33 = vld [vmem:[#allocation3 + $0x90] sm:$0xff]  ;;  %v458_v34 = vld [vmem:[#allocation3 + $0x98] sm:$0xff] }
  0x3e   :  { %1947 = vmatprep.subr.bf16.mxu0 %v1946_v15  ;;  %v1970_v35 = vpack.c.bf16 %v551_v31, %v550_v30  ;;  %v552_v36 = vld [vmem:[#allocation3 + $0xb0] sm:$0xff]  ;;  %v553_v37 = vld [vmem:[#allocation3 + $0xb8] sm:$0xff]  ;;  %v1966_v38 = vpack.c.bf16 %v458_v34, %v457_v33  ;;  %v645_v39 = vld [vmem:[#allocation3 + $0xc0] sm:$0xff] }
  0x3f   :  { %1945 = vmatpush3.bf16.msra.mxu1 %v1942_v12  ;;  %v646_v40 = vld [vmem:[#allocation3 + $0xc8] sm:$0xff]  ;;  %v1974_v41 = vpack.c.bf16 %v553_v37, %v552_v36  ;;  %v740_v42 = vld [vmem:[#allocation3 + $0xe0] sm:$0xff]  ;;  %v647_v45 = vld [vmem:[#allocation3 + $0xd0] sm:$0xff] }
  0x40   :  { %1723 = vmatmul.mubr.msk.f32.vlgmr.msra.gmra.mrb[0].mxu0 %vm66_vm0, %v2181_v21  ;;  %1955 = vmatprep.subr.bf16.mxu1 %v1954_v20  ;;  %v741_v43 = vld [vmem:[#allocation3 + $0xe8] sm:$0xff]  ;;  %v1978_v44 = vpack.c.bf16 %v646_v40, %v645_v39  ;;  %v648_v46 = vld [vmem:[#allocation3 + $0xd8] sm:$0xff]  ;;  %v742_v48 = vld [vmem:[#allocation3 + $0xf0] sm:$0xff] }
  0x41   :  { %1725 = vmatprep.mubr.msk.f32.mxu0 %vm66_vm0, %v2183_v24  ;;  %1949 = vmatpush3.bf16.msra.mxu0 %v1946_v15  ;;  %v1986_v47 = vpack.c.bf16 %v741_v43, %v740_v42  ;;  %v743_v49 = vld [vmem:[#allocation3 + $0xf8] sm:$0xff]  ;;  %v1982_v50 = vpack.c.bf16 %v648_v46, %v647_v45  ;;  %v866_v52 = vld [vmem:[#allocation7] sm:$0xff]  ;;  %v867_v53 = vld [vmem:[#allocation7 + $0x8] sm:$0xff] }
  0x42   :  { %1737 = vmatmul.mubr.msk.f32.vlgmr.msra.gmra.mrb[0].mxu1 %vm66_vm0, %v2181_v21  ;;  %1951 = vmatprep.subr.bf16.mxu0 %v1950_v25  ;;  %v1990_v51 = vpack.c.bf16 %v743_v49, %v742_v48  ;;  %v868_v54 = vld [vmem:[%s2480_s3] sm:$0xff]  ;;  %v1994_v55 = vpack.c.bf16 %v867_v53, %v866_v52  ;;  %v869_v56 = vld [vmem:[%s2480_s3 + $0x8] sm:$0xff] }
  0x43   :  { %1739 = vmatprep.mubr.msk.f32.mxu1 %vm66_vm0, %v2183_v24  ;;  %1957 = vmatpush3.bf16.msra.mxu1 %v1954_v20  ;;  %v1998_v57 = vpack.c.bf16 %v869_v56, %v868_v54 }
  0x44   :  { %1726 = vmatmul.mubr.msk.f32.gmra.mrb[2].mxu0 %vm66_vm0, %v2189_v29  ;;  %1959 = vmatprep.subr.bf16.mxu1 %v1958_v28 }
  0x45   :  { %1953 = vmatpush3.bf16.msra.mxu0 %v1950_v25  ;;  %1750 = vmatprep.mubr.msk.f32.mxu0 %vm66_vm0, %v2175_v5 }
  0x46   :  { %1740 = vmatmul.mubr.msk.f32.gmra.mrb[2].mxu1 %vm66_vm0, %v2189_v29  ;;  %1963 = vmatprep.subr.bf16.mxu0 %v1962_v32 }
  0x47   :  { %1961 = vmatpush3.bf16.msra.mxu1 %v1958_v28  ;;  %1764 = vmatprep.mubr.msk.f32.mxu1 %vm66_vm0, %v2175_v5 }
  0x48   :  { %1751 = vmatmul.mubr.msk.f32.vlgmr.msra.gmra.mrb[4].mxu0 %vm66_vm0, %v2181_v21  ;;  %1971 = vmatprep.subr.bf16.mxu1 %v1970_v35 }
  0x49   :  { %1753 = vmatprep.mubr.msk.f32.mxu0 %vm66_vm0, %v2183_v24  ;;  %1965 = vmatpush3.bf16.msra.mxu0 %v1962_v32 }
  0x4a   :  { %1765 = vmatmul.mubr.msk.f32.vlgmr.msra.gmra.mrb[4].mxu1 %vm66_vm0, %v2181_v21  ;;  %1967 = vmatprep.subr.bf16.mxu0 %v1966_v38 }
  0x4b   :  { %1767 = vmatprep.mubr.msk.f32.mxu1 %vm66_vm0, %v2183_v24  ;;  %1973 = vmatpush3.bf16.msra.mxu1 %v1970_v35 }
  0x4c   :  { %1754 = vmatmul.mubr.msk.f32.gmra.mrb[6].mxu0 %vm66_vm0, %v2189_v29  ;;  %1975 = vmatprep.subr.bf16.mxu1 %v1974_v41 }
  0x4d   :  { %1969 = vmatpush3.bf16.msra.mxu0 %v1966_v38  ;;  %1778 = vmatprep.mubr.msk.f32.mxu0 %vm66_vm0, %v2175_v5 }
  0x4e   :  { %1768 = vmatmul.mubr.msk.f32.gmra.mrb[6].mxu1 %vm66_vm0, %v2189_v29  ;;  %1979 = vmatprep.subr.bf16.mxu0 %v1978_v44 }
  0x4f   :  { %1977 = vmatpush3.bf16.msra.mxu1 %v1974_v41  ;;  %1792 = vmatprep.mubr.msk.f32.mxu1 %vm66_vm0, %v2175_v5 }
  0x50   :  { %1779 = vmatmul.mubr.msk.f32.vlgmr.msra.gmra.mrb[8].mxu0 %vm66_vm0, %v2181_v21  ;;  %1987 = vmatprep.subr.bf16.mxu1 %v1986_v47 }
  0x51   :  { %1781 = vmatprep.mubr.msk.f32.mxu0 %vm66_vm0, %v2183_v24  ;;  %1981 = vmatpush3.bf16.msra.mxu0 %v1978_v44 }
  0x52   :  { %1793 = vmatmul.mubr.msk.f32.vlgmr.msra.gmra.mrb[8].mxu1 %vm66_vm0, %v2181_v21  ;;  %1983 = vmatprep.subr.bf16.mxu0 %v1982_v50 }
  0x53   :  { %1795 = vmatprep.mubr.msk.f32.mxu1 %vm66_vm0, %v2183_v24  ;;  %1989 = vmatpush3.bf16.msra.mxu1 %v1986_v47 }
  0x54   :  { %1782 = vmatmul.mubr.msk.f32.gmra.mrb[10].mxu0 %vm66_vm0, %v2189_v29  ;;  %1991 = vmatprep.subr.bf16.mxu1 %v1990_v51 }
  0x55   :  { %1985 = vmatpush3.bf16.msra.mxu0 %v1982_v50  ;;  %1806 = vmatprep.mubr.msk.f32.mxu0 %vm66_vm0, %v2175_v5 }
  0x56   :  { %1796 = vmatmul.mubr.msk.f32.gmra.mrb[10].mxu1 %vm66_vm0, %v2189_v29  ;;  %1999 = vmatprep.subr.bf16.mxu0 %v1998_v57 }
  0x57   :  { %1993 = vmatpush3.bf16.msra.mxu1 %v1990_v51  ;;  %1820 = vmatprep.mubr.msk.f32.mxu1 %vm66_vm0, %v2175_v5 }
  0x58   :  { %1807 = vmatmul.mubr.msk.f32.vlgmr.msra.gmra.mrb[12].mxu0 %vm66_vm0, %v2181_v21  ;;  %1995 = vmatprep.subr.bf16.mxu1 %v1994_v55 }
  0x59   :  { %1809 = vmatprep.mubr.msk.f32.mxu0 %vm66_vm0, %v2183_v24  ;;  %2001 = vmatpush3.bf16.msra.mxu0 %v1998_v57 }
  0x5a   :  { %1821 = vmatmul.mubr.msk.f32.vlgmr.msra.gmra.mrb[12].mxu1 %vm66_vm0, %v2181_v21 }
  0x5b   :  { %1823 = vmatprep.mubr.msk.f32.mxu1 %vm66_vm0, %v2183_v24  ;;  %1997 = vmatpush3.bf16.msra.mxu1 %v1994_v55 }
  0x5c   :  { %1810 = vmatmul.mubr.msk.f32.gmra.mrb[14].mxu0 %vm66_vm0, %v2189_v29 }
  0x5e   :  { %1824 = vmatmul.mubr.msk.f32.gmra.mrb[14].mxu1 %vm66_vm0, %v2189_v29 }
 0x113   :  { %v1724_v58 = vpop.f32.mrb[0].mxu0 }
 0x114   :  { %166 = vst.msk [vmem:[#allocation2 + $0x8] sm:$0xff] %vm164_vm1, %v1724_v58  ;;  %v145_v59 = vpop.f32.mrb[1].mxu0 }
 0x115   :  { %165 = vst.msk [vmem:[#allocation2] sm:$0xff] %vm164_vm1, %v145_v59  ;;  %v1738_v60 = vpop.f32.mrb[0].mxu1 }
 0x116   :  { %261 = vst.msk [vmem:[#allocation2 + $0x28] sm:$0xff] %vm164_vm1, %v1738_v60  ;;  %v240_v61 = vpop.f32.mrb[1].mxu1 }
 0x117   :  { %v1727_v62 = vpop.f32.mrb[2].mxu0  ;;  %260 = vst.msk [vmem:[#allocation2 + $0x20] sm:$0xff] %vm164_vm1, %v240_v61 }
 0x118   :  { %168 = vst.msk [vmem:[#allocation2 + $0x18] sm:$0xff] %vm164_vm1, %v1727_v62  ;;  %v155_v63 = vpop.f32.mrb[3].mxu0 }
 0x119   :  { %167 = vst.msk [vmem:[#allocation2 + $0x10] sm:$0xff] %vm164_vm1, %v155_v63  ;;  %v1741_v0 = vpop.f32.mrb[2].mxu1 }
 0x11a   :  { %263 = vst.msk [vmem:[#allocation2 + $0x38] sm:$0xff] %vm164_vm1, %v1741_v0  ;;  %v250_v1 = vpop.f32.mrb[3].mxu1 }
 0x11b   :  { %262 = vst.msk [vmem:[#allocation2 + $0x30] sm:$0xff] %vm164_vm1, %v250_v1  ;;  %v1752_v2 = vpop.f32.mrb[4].mxu0  ;;  %v835_v5 = vld [vmem:[#allocation2 + $0x8] sm:$0xff] }
 0x11c   :  { %v834_v3 = vld [vmem:[#allocation2] sm:$0xff]  ;;  %356 = vst.msk [vmem:[#allocation2 + $0x48] sm:$0xff] %vm164_vm1, %v1752_v2  ;;  %v335_v4 = vpop.f32.mrb[5].mxu0 }
 0x11d   :  { %1830 = vmatprep.mubr.msk.f32.mxu1 %vm164_vm1, %v834_v3  ;;  %1882 = vmatprep.mubr.msk.f32.mxu0 %vm164_vm1, %v834_v3  ;;  %355 = vst.msk [vmem:[#allocation2 + $0x40] sm:$0xff] %vm164_vm1, %v335_v4  ;;  %v1766_v6 = vpop.f32.mrb[4].mxu1  ;;  %v839_v18 = vld [vmem:[#allocation2 + $0x28] sm:$0xff] }
 0x11e   :  { %1831 = vmatmul.mubr.msk.f32.vlgmr.msra.gmra.mrb[16].mxu1 %vm164_vm1, %v835_v5  ;;  %1883 = vmatmul.mubr.msk.f32.vlgmr.msra.gmra.mrb[16].mxu0 %vm164_vm1, %v835_v5  ;;  %451 = vst.msk [vmem:[#allocation2 + $0x68] sm:$0xff] %vm164_vm1, %v1766_v6  ;;  %v430_v7 = vpop.f32.mrb[5].mxu1  ;;  %v838_v10 = vld [vmem:[#allocation2 + $0x20] sm:$0xff] }
 0x11f   :  { %v1755_v8 = vpop.f32.mrb[6].mxu0  ;;  %450 = vst.msk [vmem:[#allocation2 + $0x60] sm:$0xff] %vm164_vm1, %v430_v7  ;;  %v837_v12 = vld [vmem:[#allocation2 + $0x18] sm:$0xff] }
 0x120   :  { %v836_v9 = vld [vmem:[#allocation2 + $0x10] sm:$0xff]  ;;  %358 = vst.msk [vmem:[#allocation2 + $0x58] sm:$0xff] %vm164_vm1, %v1755_v8  ;;  %v345_v11 = vpop.f32.mrb[7].mxu0 }
 0x121   :  { %1833 = vmatprep.mubr.msk.f32.mxu1 %vm164_vm1, %v836_v9  ;;  %1885 = vmatprep.mubr.msk.f32.mxu0 %vm164_vm1, %v836_v9  ;;  %357 = vst.msk [vmem:[#allocation2 + $0x50] sm:$0xff] %vm164_vm1, %v345_v11  ;;  %v1769_v13 = vpop.f32.mrb[6].mxu1  ;;  %v841_v24 = vld [vmem:[#allocation2 + $0x38] sm:$0xff] }
 0x122   :  { %1834 = vmatmul.mubr.msk.f32.gmra.mrb[18].mxu1 %vm164_vm1, %v837_v12  ;;  %1886 = vmatmul.mubr.msk.f32.gmra.mrb[18].mxu0 %vm164_vm1, %v837_v12  ;;  %453 = vst.msk [vmem:[#allocation2 + $0x78] sm:$0xff] %vm164_vm1, %v1769_v13  ;;  %v440_v14 = vpop.f32.mrb[7].mxu1  ;;  %v840_v16 = vld [vmem:[#allocation2 + $0x30] sm:$0xff] }
 0x123   :  { %1836 = vmatprep.mubr.msk.f32.mxu1 %vm164_vm1, %v838_v10  ;;  %1888 = vmatprep.mubr.msk.f32.mxu0 %vm164_vm1, %v838_v10  ;;  %452 = vst.msk [vmem:[#allocation2 + $0x70] sm:$0xff] %vm164_vm1, %v440_v14  ;;  %v1780_v15 = vpop.f32.mrb[8].mxu0  ;;  %v843_v30 = vld [vmem:[#allocation2 + $0x48] sm:$0xff] }
 0x124   :  { %546 = vst.msk [vmem:[#allocation2 + $0x88] sm:$0xff] %vm164_vm1, %v1780_v15  ;;  %v525_v17 = vpop.f32.mrb[9].mxu0  ;;  %v842_v22 = vld [vmem:[#allocation2 + $0x40] sm:$0xff] }
 0x125   :  { %545 = vst.msk [vmem:[#allocation2 + $0x80] sm:$0xff] %vm164_vm1, %v525_v17  ;;  %v1794_v19 = vpop.f32.mrb[8].mxu1  ;;  %v847_v40 = vld [vmem:[#allocation2 + $0x68] sm:$0xff] }
 0x126   :  { %1837 = vmatmul.mubr.msk.f32.gmra.mrb[20].mxu1 %vm164_vm1, %v839_v18  ;;  %1889 = vmatmul.mubr.msk.f32.gmra.mrb[20].mxu0 %vm164_vm1, %v839_v18  ;;  %641 = vst.msk [vmem:[#allocation2 + $0xa8] sm:$0xff] %vm164_vm1, %v1794_v19  ;;  %v620_v20 = vpop.f32.mrb[9].mxu1  ;;  %v846_v34 = vld [vmem:[#allocation2 + $0x60] sm:$0xff] }
 0x127   :  { %1839 = vmatprep.mubr.msk.f32.mxu1 %vm164_vm1, %v840_v16  ;;  %1891 = vmatprep.mubr.msk.f32.mxu0 %vm164_vm1, %v840_v16  ;;  %v1783_v21 = vpop.f32.mrb[10].mxu0  ;;  %640 = vst.msk [vmem:[#allocation2 + $0xa0] sm:$0xff] %vm164_vm1, %v620_v20  ;;  %v845_v36 = vld [vmem:[#allocation2 + $0x58] sm:$0xff] }
 0x128   :  { %548 = vst.msk [vmem:[#allocation2 + $0x98] sm:$0xff] %vm164_vm1, %v1783_v21  ;;  %v535_v23 = vpop.f32.mrb[11].mxu0  ;;  %v844_v28 = vld [vmem:[#allocation2 + $0x50] sm:$0xff] }
 0x129   :  { %547 = vst.msk [vmem:[#allocation2 + $0x90] sm:$0xff] %vm164_vm1, %v535_v23  ;;  %v1797_v25 = vpop.f32.mrb[10].mxu1  ;;  %v849_v42 = vld [vmem:[#allocation2 + $0x78] sm:$0xff] }
 0x12a   :  { %1840 = vmatmul.mubr.msk.f32.gmra.mrb[22].mxu1 %vm164_vm1, %v841_v24  ;;  %1892 = vmatmul.mubr.msk.f32.gmra.mrb[22].mxu0 %vm164_vm1, %v841_v24  ;;  %643 = vst.msk [vmem:[#allocation2 + $0xb8] sm:$0xff] %vm164_vm1, %v1797_v25  ;;  %v630_v26 = vpop.f32.mrb[11].mxu1  ;;  %v848_v39 = vld [vmem:[#allocation2 + $0x70] sm:$0xff] }
 0x12b   :  { %1842 = vmatprep.mubr.msk.f32.mxu1 %vm164_vm1, %v842_v22  ;;  %1894 = vmatprep.mubr.msk.f32.mxu0 %vm164_vm1, %v842_v22  ;;  %642 = vst.msk [vmem:[#allocation2 + $0xb0] sm:$0xff] %vm164_vm1, %v630_v26  ;;  %v1808_v27 = vpop.f32.mrb[12].mxu0  ;;  %v851_v44 = vld [vmem:[#allocation2 + $0x88] sm:$0xff] }
 0x12c   :  { %736 = vst.msk [vmem:[#allocation2 + $0xc8] sm:$0xff] %vm164_vm1, %v1808_v27  ;;  %v715_v29 = vpop.f32.mrb[13].mxu0  ;;  %v850_v41 = vld [vmem:[#allocation2 + $0x80] sm:$0xff] }
 0x12d   :  { %735 = vst.msk [vmem:[#allocation2 + $0xc0] sm:$0xff] %vm164_vm1, %v715_v29  ;;  %v1822_v31 = vpop.f32.mrb[12].mxu1  ;;  %v855_v48 = vld [vmem:[#allocation2 + $0xa8] sm:$0xff] }
 0x12e   :  { %1843 = vmatmul.mubr.msk.f32.gmra.mrb[24].mxu1 %vm164_vm1, %v843_v30  ;;  %1895 = vmatmul.mubr.msk.f32.gmra.mrb[24].mxu0 %vm164_vm1, %v843_v30  ;;  %831 = vst.msk [vmem:[#allocation2 + $0xe8] sm:$0xff] %vm164_vm1, %v1822_v31  ;;  %v810_v32 = vpop.f32.mrb[13].mxu1  ;;  %v854_v45 = vld [vmem:[#allocation2 + $0xa0] sm:$0xff] }
 0x12f   :  { %1845 = vmatprep.mubr.msk.f32.mxu1 %vm164_vm1, %v844_v28  ;;  %1897 = vmatprep.mubr.msk.f32.mxu0 %vm164_vm1, %v844_v28  ;;  %v1811_v33 = vpop.f32.mrb[14].mxu0  ;;  %830 = vst.msk [vmem:[#allocation2 + $0xe0] sm:$0xff] %vm164_vm1, %v810_v32  ;;  %v853_v46 = vld [vmem:[#allocation2 + $0x98] sm:$0xff] }
 0x130   :  { %738 = vst.msk [vmem:[#allocation2 + $0xd8] sm:$0xff] %vm164_vm1, %v1811_v33  ;;  %v725_v35 = vpop.f32.mrb[15].mxu0  ;;  %v852_v43 = vld [vmem:[#allocation2 + $0x90] sm:$0xff] }
 0x131   :  { %737 = vst.msk [vmem:[#allocation2 + $0xd0] sm:$0xff] %vm164_vm1, %v725_v35  ;;  %v1825_v37 = vpop.f32.mrb[14].mxu1  ;;  %v857_v50 = vld [vmem:[#allocation2 + $0xb8] sm:$0xff] }
 0x132   :  { %1846 = vmatmul.mubr.msk.f32.gmra.mrb[26].mxu1 %vm164_vm1, %v845_v36  ;;  %1898 = vmatmul.mubr.msk.f32.gmra.mrb[26].mxu0 %vm164_vm1, %v845_v36  ;;  %833 = vst.msk [vmem:[#allocation2 + $0xf8] sm:$0xff] %vm164_vm1, %v1825_v37  ;;  %v820_v38 = vpop.f32.mrb[15].mxu1  ;;  %v856_v47 = vld [vmem:[#allocation2 + $0xb0] sm:$0xff] }
 0x133   :  { %1848 = vmatprep.mubr.msk.f32.mxu1 %vm164_vm1, %v846_v34  ;;  %1900 = vmatprep.mubr.msk.f32.mxu0 %vm164_vm1, %v846_v34  ;;  %832 = vst.msk [vmem:[#allocation2 + $0xf0] sm:$0xff] %vm164_vm1, %v820_v38  ;;  %v859_v52 = vld [vmem:[#allocation2 + $0xc8] sm:$0xff] }
 0x134   :  { %v858_v49 = vld [vmem:[#allocation2 + $0xc0] sm:$0xff] }
 0x135   :  { %v863_v56 = vld [vmem:[#allocation2 + $0xe8] sm:$0xff] }
 0x136   :  { %1849 = vmatmul.mubr.msk.f32.gmra.mrb[28].mxu1 %vm164_vm1, %v847_v40  ;;  %1901 = vmatmul.mubr.msk.f32.gmra.mrb[28].mxu0 %vm164_vm1, %v847_v40  ;;  %v862_v53 = vld [vmem:[#allocation2 + $0xe0] sm:$0xff] }
 0x137   :  { %1851 = vmatprep.mubr.msk.f32.mxu1 %vm164_vm1, %v848_v39  ;;  %1903 = vmatprep.mubr.msk.f32.mxu0 %vm164_vm1, %v848_v39  ;;  %v861_v54 = vld [vmem:[#allocation2 + $0xd8] sm:$0xff] }
 0x138   :  { %v860_v51 = vld [vmem:[#allocation2 + $0xd0] sm:$0xff] }
 0x139   :  { %v865_v57 = vld [vmem:[#allocation2 + $0xf8] sm:$0xff] }
 0x13a   :  { %1852 = vmatmul.mubr.msk.f32.gmra.mrb[30].mxu1 %vm164_vm1, %v849_v42  ;;  %1904 = vmatmul.mubr.msk.f32.gmra.mrb[30].mxu0 %vm164_vm1, %v849_v42  ;;  %v864_v55 = vld [vmem:[#allocation2 + $0xf0] sm:$0xff] }
 0x13b   :  { %1854 = vmatprep.mubr.msk.f32.mxu1 %vm164_vm1, %v850_v41  ;;  %1906 = vmatprep.mubr.msk.f32.mxu0 %vm164_vm1, %v850_v41 }
 0x13e   :  { %1855 = vmatmul.mubr.msk.f32.gmra.mrb[32].mxu1 %vm164_vm1, %v851_v44  ;;  %1907 = vmatmul.mubr.msk.f32.gmra.mrb[32].mxu0 %vm164_vm1, %v851_v44 }
 0x13f   :  { %1857 = vmatprep.mubr.msk.f32.mxu1 %vm164_vm1, %v852_v43  ;;  %1909 = vmatprep.mubr.msk.f32.mxu0 %vm164_vm1, %v852_v43 }
 0x142   :  { %1858 = vmatmul.mubr.msk.f32.gmra.mrb[34].mxu1 %vm164_vm1, %v853_v46  ;;  %1910 = vmatmul.mubr.msk.f32.gmra.mrb[34].mxu0 %vm164_vm1, %v853_v46 }
 0x143   :  { %1860 = vmatprep.mubr.msk.f32.mxu1 %vm164_vm1, %v854_v45  ;;  %1912 = vmatprep.mubr.msk.f32.mxu0 %vm164_vm1, %v854_v45 }
 0x146   :  { %1861 = vmatmul.mubr.msk.f32.gmra.mrb[36].mxu1 %vm164_vm1, %v855_v48  ;;  %1913 = vmatmul.mubr.msk.f32.gmra.mrb[36].mxu0 %vm164_vm1, %v855_v48 }
 0x147   :  { %1863 = vmatprep.mubr.msk.f32.mxu1 %vm164_vm1, %v856_v47  ;;  %1915 = vmatprep.mubr.msk.f32.mxu0 %vm164_vm1, %v856_v47 }
 0x14a   :  { %1864 = vmatmul.mubr.msk.f32.gmra.mrb[38].mxu1 %vm164_vm1, %v857_v50  ;;  %1916 = vmatmul.mubr.msk.f32.gmra.mrb[38].mxu0 %vm164_vm1, %v857_v50 }
 0x14b   :  { %1866 = vmatprep.mubr.msk.f32.mxu1 %vm164_vm1, %v858_v49  ;;  %1918 = vmatprep.mubr.msk.f32.mxu0 %vm164_vm1, %v858_v49 }
 0x14e   :  { %1867 = vmatmul.mubr.msk.f32.gmra.mrb[40].mxu1 %vm164_vm1, %v859_v52  ;;  %1919 = vmatmul.mubr.msk.f32.gmra.mrb[40].mxu0 %vm164_vm1, %v859_v52 }
 0x14f   :  { %1869 = vmatprep.mubr.msk.f32.mxu1 %vm164_vm1, %v860_v51  ;;  %1921 = vmatprep.mubr.msk.f32.mxu0 %vm164_vm1, %v860_v51 }
 0x152   :  { %1870 = vmatmul.mubr.msk.f32.gmra.mrb[42].mxu1 %vm164_vm1, %v861_v54  ;;  %1922 = vmatmul.mubr.msk.f32.gmra.mrb[42].mxu0 %vm164_vm1, %v861_v54 }
 0x153   :  { %1872 = vmatprep.mubr.msk.f32.mxu1 %vm164_vm1, %v862_v53  ;;  %1924 = vmatprep.mubr.msk.f32.mxu0 %vm164_vm1, %v862_v53 }
 0x156   :  { %1873 = vmatmul.mubr.msk.f32.gmra.mrb[44].mxu1 %vm164_vm1, %v863_v56  ;;  %1925 = vmatmul.mubr.msk.f32.gmra.mrb[44].mxu0 %vm164_vm1, %v863_v56 }
 0x157   :  { %1875 = vmatprep.mubr.msk.f32.mxu1 %vm164_vm1, %v864_v55  ;;  %1927 = vmatprep.mubr.msk.f32.mxu0 %vm164_vm1, %v864_v55 }
 0x15a   :  { %1876 = vmatmul.mubr.msk.f32.gmra.mrb[46].mxu1 %vm164_vm1, %v865_v57  ;;  %1928 = vmatmul.mubr.msk.f32.gmra.mrb[46].mxu0 %vm164_vm1, %v865_v57 }
 0x1f1   :  { %v1832_v58 = vpop.f32.mrb[16].mxu1  ;;  %v1884_v59 = vpop.f32.mrb[16].mxu0 }
 0x1f2   :  { %v1032_v60 = vpop.f32.mrb[17].mxu1  ;;  %v1257_v61 = vpop.f32.mrb[17].mxu0 }
 0x1f5   :  { %v1835_v62 = vpop.f32.mrb[18].mxu1  ;;  %v1887_v63 = vpop.f32.mrb[18].mxu0 }
 0x1f6   :  { %v1449_v0 = vadd.f32 %v1884_v59, %v1835_v62  ;;  %v1417_v1 = vsub.f32 %v1832_v58, %v1887_v63  ;;  %v1042_v2 = vpop.f32.mrb[19].mxu1  ;;  %v1267_v3 = vpop.f32.mrb[19].mxu0 }
 0x1f7   :  { %v1448_v4 = vadd.f32 %v1257_v61, %v1042_v2  ;;  %v1416_v5 = vsub.f32 %v1032_v60, %v1267_v3 }
 0x1f8   :  { %1465 = vst.msk [vmem:[%s2481_s4 + $0x18] sm:$0xff] %vm164_vm1, %v1449_v0  ;;  %1433 = vst.msk [vmem:[%s2481_s4 + $0x8] sm:$0xff] %vm164_vm1, %v1417_v1 }
 0x1f9   :  { %1464 = vst.msk [vmem:[%s2481_s4 + $0x10] sm:$0xff] %vm164_vm1, %v1448_v4  ;;  %1432 = vst.msk [vmem:[%s2481_s4] sm:$0xff] %vm164_vm1, %v1416_v5  ;;  %v1838_v6 = vpop.f32.mrb[20].mxu1  ;;  %v1890_v7 = vpop.f32.mrb[20].mxu0 }
 0x1fa   :  { %v1052_v8 = vpop.f32.mrb[21].mxu1  ;;  %v1277_v9 = vpop.f32.mrb[21].mxu0 }
 0x1fd   :  { %v1841_v10 = vpop.f32.mrb[22].mxu1  ;;  %v1893_v11 = vpop.f32.mrb[22].mxu0 }
 0x1fe   :  { %v1451_v12 = vadd.f32 %v1890_v7, %v1841_v10  ;;  %v1419_v13 = vsub.f32 %v1838_v6, %v1893_v11  ;;  %v1062_v14 = vpop.f32.mrb[23].mxu1  ;;  %v1287_v15 = vpop.f32.mrb[23].mxu0 }
 0x1ff   :  { %v1450_v16 = vadd.f32 %v1277_v9, %v1062_v14  ;;  %v1418_v17 = vsub.f32 %v1052_v8, %v1287_v15 }
 0x200   :  { %1467 = vst.msk [vmem:[%s2481_s4 + $0x38] sm:$0xff] %vm164_vm1, %v1451_v12  ;;  %1435 = vst.msk [vmem:[%s2481_s4 + $0x28] sm:$0xff] %vm164_vm1, %v1419_v13 }
 0x201   :  { %1466 = vst.msk [vmem:[%s2481_s4 + $0x30] sm:$0xff] %vm164_vm1, %v1450_v16  ;;  %1434 = vst.msk [vmem:[%s2481_s4 + $0x20] sm:$0xff] %vm164_vm1, %v1418_v17  ;;  %v1844_v18 = vpop.f32.mrb[24].mxu1  ;;  %v1896_v19 = vpop.f32.mrb[24].mxu0 }
 0x202   :  { %v1072_v20 = vpop.f32.mrb[25].mxu1  ;;  %v1297_v21 = vpop.f32.mrb[25].mxu0 }
 0x205   :  { %v1847_v22 = vpop.f32.mrb[26].mxu1  ;;  %v1899_v23 = vpop.f32.mrb[26].mxu0 }
 0x206   :  { %v1453_v24 = vadd.f32 %v1896_v19, %v1847_v22  ;;  %v1421_v25 = vsub.f32 %v1844_v18, %v1899_v23  ;;  %v1082_v26 = vpop.f32.mrb[27].mxu1  ;;  %v1307_v27 = vpop.f32.mrb[27].mxu0 }
 0x207   :  { %v1452_v28 = vadd.f32 %v1297_v21, %v1082_v26  ;;  %v1420_v29 = vsub.f32 %v1072_v20, %v1307_v27 }
 0x208   :  { %1469 = vst.msk [vmem:[%s2481_s4 + $0x58] sm:$0xff] %vm164_vm1, %v1453_v24  ;;  %1437 = vst.msk [vmem:[%s2481_s4 + $0x48] sm:$0xff] %vm164_vm1, %v1421_v25 }
 0x209   :  { %1468 = vst.msk [vmem:[%s2481_s4 + $0x50] sm:$0xff] %vm164_vm1, %v1452_v28  ;;  %1436 = vst.msk [vmem:[%s2481_s4 + $0x40] sm:$0xff] %vm164_vm1, %v1420_v29  ;;  %v1850_v30 = vpop.f32.mrb[28].mxu1  ;;  %v1902_v31 = vpop.f32.mrb[28].mxu0 }
 0x20a   :  { %v1092_v32 = vpop.f32.mrb[29].mxu1  ;;  %v1317_v33 = vpop.f32.mrb[29].mxu0 }
 0x20d   :  { %v1853_v34 = vpop.f32.mrb[30].mxu1  ;;  %v1905_v35 = vpop.f32.mrb[30].mxu0 }
 0x20e   :  { %v1455_v36 = vadd.f32 %v1902_v31, %v1853_v34  ;;  %v1423_v37 = vsub.f32 %v1850_v30, %v1905_v35  ;;  %v1102_v38 = vpop.f32.mrb[31].mxu1  ;;  %v1327_v39 = vpop.f32.mrb[31].mxu0 }
 0x20f   :  { %v1454_v40 = vadd.f32 %v1317_v33, %v1102_v38  ;;  %v1422_v41 = vsub.f32 %v1092_v32, %v1327_v39 }
 0x210   :  { %1471 = vst.msk [vmem:[%s2481_s4 + $0x78] sm:$0xff] %vm164_vm1, %v1455_v36  ;;  %1439 = vst.msk [vmem:[%s2481_s4 + $0x68] sm:$0xff] %vm164_vm1, %v1423_v37 }
 0x211   :  { %1470 = vst.msk [vmem:[%s2481_s4 + $0x70] sm:$0xff] %vm164_vm1, %v1454_v40  ;;  %1438 = vst.msk [vmem:[%s2481_s4 + $0x60] sm:$0xff] %vm164_vm1, %v1422_v41  ;;  %v1856_v42 = vpop.f32.mrb[32].mxu1  ;;  %v1908_v43 = vpop.f32.mrb[32].mxu0 }
 0x212   :  { %v1112_v44 = vpop.f32.mrb[33].mxu1  ;;  %v1337_v45 = vpop.f32.mrb[33].mxu0 }
 0x215   :  { %v1859_v46 = vpop.f32.mrb[34].mxu1  ;;  %v1911_v47 = vpop.f32.mrb[34].mxu0 }
 0x216   :  { %v1457_v48 = vadd.f32 %v1908_v43, %v1859_v46  ;;  %v1425_v49 = vsub.f32 %v1856_v42, %v1911_v47  ;;  %v1122_v50 = vpop.f32.mrb[35].mxu1  ;;  %v1347_v51 = vpop.f32.mrb[35].mxu0 }
 0x217   :  { %v1456_v52 = vadd.f32 %v1337_v45, %v1122_v50  ;;  %v1424_v53 = vsub.f32 %v1112_v44, %v1347_v51 }
 0x218   :  { %1473 = vst.msk [vmem:[%s2481_s4 + $0x98] sm:$0xff] %vm164_vm1, %v1457_v48  ;;  %1441 = vst.msk [vmem:[%s2481_s4 + $0x88] sm:$0xff] %vm164_vm1, %v1425_v49 }
 0x219   :  { %1472 = vst.msk [vmem:[%s2481_s4 + $0x90] sm:$0xff] %vm164_vm1, %v1456_v52  ;;  %1440 = vst.msk [vmem:[%s2481_s4 + $0x80] sm:$0xff] %vm164_vm1, %v1424_v53  ;;  %v1862_v54 = vpop.f32.mrb[36].mxu1  ;;  %v1914_v55 = vpop.f32.mrb[36].mxu0 }
 0x21a   :  { %v1132_v56 = vpop.f32.mrb[37].mxu1  ;;  %v1357_v57 = vpop.f32.mrb[37].mxu0 }
 0x21d   :  { %v1865_v58 = vpop.f32.mrb[38].mxu1  ;;  %v1917_v59 = vpop.f32.mrb[38].mxu0 }
 0x21e   :  { %v1459_v60 = vadd.f32 %v1914_v55, %v1865_v58  ;;  %v1427_v61 = vsub.f32 %v1862_v54, %v1917_v59  ;;  %v1142_v62 = vpop.f32.mrb[39].mxu1  ;;  %v1367_v63 = vpop.f32.mrb[39].mxu0 }
 0x21f   :  { %v1458_v0 = vadd.f32 %v1357_v57, %v1142_v62  ;;  %v1426_v1 = vsub.f32 %v1132_v56, %v1367_v63 }
 0x220   :  { %1475 = vst.msk [vmem:[%s2481_s4 + $0xb8] sm:$0xff] %vm164_vm1, %v1459_v60  ;;  %1443 = vst.msk [vmem:[%s2481_s4 + $0xa8] sm:$0xff] %vm164_vm1, %v1427_v61 }
 0x221   :  { %1474 = vst.msk [vmem:[%s2481_s4 + $0xb0] sm:$0xff] %vm164_vm1, %v1458_v0  ;;  %1442 = vst.msk [vmem:[%s2481_s4 + $0xa0] sm:$0xff] %vm164_vm1, %v1426_v1  ;;  %v1868_v2 = vpop.f32.mrb[40].mxu1  ;;  %v1920_v3 = vpop.f32.mrb[40].mxu0 }
 0x222   :  { %v1152_v4 = vpop.f32.mrb[41].mxu1  ;;  %v1377_v5 = vpop.f32.mrb[41].mxu0 }
 0x225   :  { %v1871_v6 = vpop.f32.mrb[42].mxu1  ;;  %v1923_v7 = vpop.f32.mrb[42].mxu0 }
 0x226   :  { %v1461_v8 = vadd.f32 %v1920_v3, %v1871_v6  ;;  %v1429_v9 = vsub.f32 %v1868_v2, %v1923_v7  ;;  %v1162_v10 = vpop.f32.mrb[43].mxu1  ;;  %v1387_v11 = vpop.f32.mrb[43].mxu0 }
 0x227   :  { %v1460_v12 = vadd.f32 %v1377_v5, %v1162_v10  ;;  %v1428_v13 = vsub.f32 %v1152_v4, %v1387_v11 }
 0x228   :  { %1477 = vst.msk [vmem:[%s2481_s4 + $0xd8] sm:$0xff] %vm164_vm1, %v1461_v8  ;;  %1445 = vst.msk [vmem:[%s2481_s4 + $0xc8] sm:$0xff] %vm164_vm1, %v1429_v9 }
 0x229   :  { %1476 = vst.msk [vmem:[%s2481_s4 + $0xd0] sm:$0xff] %vm164_vm1, %v1460_v12  ;;  %1444 = vst.msk [vmem:[%s2481_s4 + $0xc0] sm:$0xff] %vm164_vm1, %v1428_v13  ;;  %v1874_v14 = vpop.f32.mrb[44].mxu1  ;;  %v1926_v15 = vpop.f32.mrb[44].mxu0 }
 0x22a   :  { %v1172_v16 = vpop.f32.mrb[45].mxu1  ;;  %v1397_v17 = vpop.f32.mrb[45].mxu0 }
 0x22d   :  { %v1877_v18 = vpop.f32.mrb[46].mxu1  ;;  %v1929_v19 = vpop.f32.mrb[46].mxu0 }
 0x22e   :  { %v1463_v20 = vadd.f32 %v1926_v15, %v1877_v18  ;;  %v1431_v21 = vsub.f32 %v1874_v14, %v1929_v19  ;;  %v1182_v22 = vpop.f32.mrb[47].mxu1  ;;  %v1407_v23 = vpop.f32.mrb[47].mxu0 }
 0x22f   :  { %v1462_v24 = vadd.f32 %v1397_v17, %v1182_v22  ;;  %v1430_v25 = vsub.f32 %v1172_v16, %v1407_v23 }
 0x230   :  { %1479 = vst.msk [vmem:[%s2481_s4 + $0xf8] sm:$0xff] %vm164_vm1, %v1463_v20  ;;  %1447 = vst.msk [vmem:[%s2481_s4 + $0xe8] sm:$0xff] %vm164_vm1, %v1431_v21 }
 0x231   :  { %1478 = vst.msk [vmem:[%s2481_s4 + $0xf0] sm:$0xff] %vm164_vm1, %v1462_v24  ;;  %1446 = vst.msk [vmem:[%s2481_s4 + $0xe0] sm:$0xff] %vm164_vm1, %v1430_v25 }
 0x232   :  { %1484 = vsyncpa [#allocation4], 1 }
 0x233   :  { %1485 = vsyncpa [#allocation6], 1 }

</bundles_post_ra>
